<compile_context>
chip_gen: v7x
topology: tpu7x:2x2x1
jax: 0.10.0
libtpu: 0.0.40
codegen_flags: <defaults>
</compile_context>

<pallas_src>
import jax
import jax.numpy as jnp
from jax.experimental import pallas as pl
from jax.experimental.pallas import tpu as pltpu

EMBED = 128              # feature_dim / embed_dim
HEADS = 8
HEAD_DIM = EMBED // HEADS
FUTURE_STEPS = 80        # FeatureFusion hard-codes future_steps=80 -> Linear(160, 128)
PRED_FEAT = FUTURE_STEPS * 2        # 160
NUM_MODES = 6
HIDDEN = 2 * EMBED       # probability decoder hidden width (256)


# ----------------------------------------------------------------------------
# Fused kernel: FeatureFusion (folded + K|V-packed projections, streamed
# 8-head cross attention with a single ego query token) + fused probability /
# anchor decoders.  Processes a block of B_blk batch rows per grid step.
# ----------------------------------------------------------------------------
def _fused_kernel(ego_ref, map_ref, oth_ref, pred_ref,
                  wqo_ref, wkvmo_ref, wkvp_ref, bkv_ref, bqo_ref,
                  hsum_ref, hexp_ref,
                  wdec1_ref, lnd_ref, wdec2_ref, bdec2_ref,
                  gf_ref, dec_ref):
    f32 = jnp.float32
    bf16 = jnp.bfloat16
    B, M, _ = map_ref.shape
    A = oth_ref.shape[1]
    N = pred_ref.shape[1]

    # q projection (bf16 x bf16, f32 accumulate).
    q = (jnp.dot(ego_ref[...], wqo_ref[0], preferred_element_type=f32)
         + bqo_ref[0:1, :])                                        # (B, 128)
    q3 = q.reshape(B, 1, EMBED)
    hsum = hsum_ref[...]          # block-diagonal head-sum, 1/sqrt(hd) folded in
    hexp = hexp_ref[...]          # its (unscaled) transpose: head -> 128 lanes

    # Per-source: one (in, 256) matmul produces [K|V]; per-head scores via the
    # head-sum matmul.  No k/v concatenation; sources are streamed.
    def project_scores(x_ref, n_tok, w_kv, b_kv):
        x2 = x_ref[...].reshape(B * n_tok, x_ref.shape[-1])
        kv = (jnp.dot(x2, w_kv, preferred_element_type=f32)
              + b_kv).reshape(B, n_tok, 2 * EMBED)
        k = kv[:, :, :EMBED]
        v = kv[:, :, EMBED:]
        s = jnp.dot((k * q3).reshape(B * n_tok, EMBED), hsum,
                    preferred_element_type=f32).reshape(B, n_tok, EMBED)
        return s, v

    s_m, v_m = project_scores(map_ref, M, wkvmo_ref[0], bkv_ref[0:1, :])
    s_o, v_o = project_scores(oth_ref, A, wkvmo_ref[1], bkv_ref[1:2, :])
    s_p, v_p = project_scores(pred_ref, N, wkvp_ref[...], bkv_ref[2:3, :])

    # shared max over all keys of all sources (per head, per batch row)
    m = jnp.maximum(jnp.maximum(jnp.max(s_m, axis=1, keepdims=True),
                                jnp.max(s_o, axis=1, keepdims=True)),
                    jnp.max(s_p, axis=1, keepdims=True))           # (B, 1, 128)

    # deferred softmax normalization: accumulate numerator and denominator,
    # divide once with an EUP approx reciprocal.
    def accumulate(s, v, n_tok):
        p = jnp.exp(s - m)                                         # (B, n, 128)
        p128 = jnp.dot(p.reshape(B * n_tok, EMBED), hexp,
                       preferred_element_type=f32).reshape(B, n_tok, EMBED)
        return jnp.sum(p128 * v, axis=1), jnp.sum(p128, axis=1)

    num_m, den_m = accumulate(s_m, v_m, M)
    num_o, den_o = accumulate(s_o, v_o, A)
    num_p, den_p = accumulate(s_p, v_p, N)
    num = num_m + num_o + num_p                                    # (B, 128)
    den = den_m + den_o + den_p                                    # (B, 128), >= 1
    attn = num * pl.reciprocal(den, approx=True)

    gf = (jnp.dot(attn.astype(bf16), wqo_ref[1], preferred_element_type=f32)
          + bqo_ref[1:2, :])                                       # (B, 128)
    gf_ref[...] = gf.astype(gf_ref.dtype)

    # Fused probability decoders: one (128,512) matmul -> per-256-lane-half
    # LayerNorm + ReLU -> one block-diagonal (512,256) matmul, single 256-lane
    # [prob | anchor] store.
    h = (jnp.dot(gf.astype(bf16), wdec1_ref[...], preferred_element_type=f32)
         + lnd_ref[0:1, :])                                        # (B, 512)

    def ln_relu(hh, g, b):
        mu = jnp.mean(hh, axis=-1, keepdims=True)
        var = jnp.mean((hh - mu) ** 2, axis=-1, keepdims=True)
        return jnp.maximum((hh - mu) * jax.lax.rsqrt(var + 1e-5) * g + b, 0.0)

    h1 = ln_relu(h[:, :HIDDEN], lnd_ref[1:2, :HIDDEN], lnd_ref[2:3, :HIDDEN])
    h2 = ln_relu(h[:, HIDDEN:], lnd_ref[1:2, HIDDEN:], lnd_ref[2:3, HIDDEN:])
    hc = jnp.concatenate([h1, h2], axis=-1).astype(bf16)           # (B, 512)
    dec = (jnp.dot(hc, wdec2_ref[...], preferred_element_type=f32)
           + bdec2_ref[...])                                       # (B, 256)
    dec_ref[...] = dec.astype(dec_ref.dtype)


def _pick_batch_block(bs, batch_block):
    """Choose a batch block that satisfies the (8,128) rule on the 2D batch
    tensors (divisible by 8 or full extent) and avoids HBM padding copies
    whenever a suitable divisor of bs exists."""
    if bs <= batch_block:
        return bs                       # single block == full extent, no pad
    b = (batch_block // 8) * 8
    while b >= 8:
        if bs % b == 0:                 # divisor -> no wrapper-side padding
            return b
        b -= 8
    return max((batch_block // 8) * 8, 8)   # fall back: pad the batch


def fused_fusion_and_decoders(packed, ego, map_feat, other_feat, prediction,
                              *, batch_block=32,
                              vmem_limit_bytes=48 * 1024 * 1024):
    """Runs the fused kernel. Returns (global_feature, probability, anchor_prob).

    batch_block: rows per grid step.  32-64 keeps MXU rows well utilized on
    v6e/v7x while staying far under VMEM limits at these token counts; keep at
    least 2 grid steps when bs permits so v7x's two TensorCores both get work.
    vmem_limit_bytes: 48 MiB is above the 16/32 MiB scoped defaults and below
    v7x's 64 MiB physical VMEM.
    """
    bs = ego.shape[0]
    M = map_feat.shape[1]
    A = other_feat.shape[1]
    N = prediction.shape[1]

    bf16 = jnp.bfloat16
    ego2d = ego.reshape(bs, EMBED).astype(bf16)
    mapf = map_feat.astype(bf16)
    othf = other_feat.astype(bf16)
    predf = prediction.reshape(bs, N, -1).astype(bf16)       # (bs, N, 160)
    Fp = predf.shape[-1]

    B_blk = _pick_batch_block(bs, batch_block)
    bs_pad = -(-bs // B_blk) * B_blk
    if bs_pad != bs:
        # Rare fallback (bs has no multiple-of-8 divisor <= batch_block).
        # Padded rows are all-zero, computed and discarded -- keep the slice.
        pb = ((0, bs_pad - bs),)
        ego2d = jnp.pad(ego2d, pb + ((0, 0),))
        mapf = jnp.pad(mapf, pb + ((0, 0), (0, 0)))
        othf = jnp.pad(othf, pb + ((0, 0), (0, 0)))
        predf = jnp.pad(predf, pb + ((0, 0), (0, 0)))
    nb = bs_pad // B_blk

    def resident(x):
        zeros = (0,) * x.ndim
        return pl.BlockSpec(x.shape, lambda i, z=zeros: z)

    w = packed
    in_specs = [
        pl.BlockSpec((B_blk, EMBED), lambda i: (i, 0)),
        pl.BlockSpec((B_blk, M, EMBED), lambda i: (i, 0, 0)),
        pl.BlockSpec((B_blk, A, EMBED), lambda i: (i, 0, 0)),
        pl.BlockSpec((B_blk, N, Fp), lambda i: (i, 0, 0)),
        resident(w["w_qo"]), resident(w["w_kv_mo"]), resident(w["w_kv_prd"]),
        resident(w["b_kv"]), resident(w["b_qo"]),
        resident(w["head_sum"]), resident(w["head_exp"]),
        resident(w["w_dec1"]), resident(w["ln_dec"]),
        resident(w["w_dec2"]), resident(w["b_dec2"]),
    ]
    out_specs = [pl.BlockSpec((B_blk, EMBED), lambda i: (i, 0)),
                 pl.BlockSpec((B_blk, 2 * EMBED), lambda i: (i, 0))]
    out_shape = [jax.ShapeDtypeStruct((bs_pad, EMBED), jnp.float32),
                 jax.ShapeDtypeStruct((bs_pad, 2 * EMBED), jnp.float32)]

    gf, dec = pl.pallas_call(
        _fused_kernel,
        out_shape=out_shape,
        grid=(nb,),
        in_specs=in_specs,
        out_specs=out_specs,
        compiler_params=pltpu.CompilerParams(
            dimension_semantics=("parallel",),
            vmem_limit_bytes=vmem_limit_bytes),
    )(ego2d, mapf, othf, predf,
      w["w_qo"], w["w_kv_mo"], w["w_kv_prd"], w["b_kv"], w["b_qo"],
      w["head_sum"], w["head_exp"],
      w["w_dec1"], w["ln_dec"], w["w_dec2"], w["b_dec2"])

    probability = dec[:bs, :NUM_MODES]
    anchor_prob = dec[:bs, EMBED:EMBED + NUM_MODES]
    return gf[:bs], probability, anchor_prob


# ----------------------------------------------------------------------------
# Parameter initialization (deterministic, synthetic) + packing/folding.
# ----------------------------------------------------------------------------
def _linear(key, fan_in, fan_out, scale=0.02):
    return (jax.random.normal(key, (fan_in, fan_out), jnp.float32) * scale,
            jnp.zeros((1, fan_out), jnp.float32))


def init_params(key):
    ks = jax.random.split(key, 16)
    fusion = {}
    fusion["w_pe"], fusion["b_pe"] = _linear(ks[0], PRED_FEAT, EMBED)
    fusion["w_map"], fusion["b_map"] = _linear(ks[1], EMBED, EMBED)
    fusion["w_oth"], fusion["b_oth"] = _linear(ks[2], EMBED, EMBED)
    fusion["w_prj"], fusion["b_prj"] = _linear(ks[3], EMBED, EMBED)
    fusion["w_q"], fusion["b_q"] = _linear(ks[4], EMBED, EMBED)
    fusion["w_k"], fusion["b_k"] = _linear(ks[5], EMBED, EMBED)
    fusion["w_v"], fusion["b_v"] = _linear(ks[6], EMBED, EMBED)
    fusion["w_o"], fusion["b_o"] = _linear(ks[7], EMBED, EMBED)

    def decoder(k1, k2):
        w1, b1 = _linear(k1, EMBED, HIDDEN)
        g = jnp.ones((1, HIDDEN), jnp.float32)
        beta = jnp.zeros((1, HIDDEN), jnp.float32)
        w2, b2 = _linear(k2, HIDDEN, NUM_MODES)
        return (w1, b1, g, beta, w2, b2)

    return {
        "fusion": fusion,
        "prob_dec": decoder(ks[8], ks[9]),      # probability_decoder
        "anchor_dec": decoder(ks[10], ks[11]),  # prob_decoder_anchor
    }


def pack_params(params):
    """Fold the source projections into K/V, pack K|V into 256-lane slabs,
    fold the attention scale into head_sum, fuse the two decoders, cast the
    matmul slabs to bf16 (biases / LN params stay f32)."""
    f = params["fusion"]
    bf16 = jnp.bfloat16
    w_k, b_k = f["w_k"], f["b_k"]
    w_v, b_v = f["w_v"], f["b_v"]

    def fold_kv(w_src, b_src):
        wk, bk = w_src @ w_k, b_src @ w_k + b_k
        wv, bv = w_src @ w_v, b_src @ w_v + b_v
        return (jnp.concatenate([wk, wv], axis=1),        # (in, 256)
                jnp.concatenate([bk, bv], axis=1))        # (1, 256)

    w_kv_map, b_kv_map = fold_kv(f["w_map"], f["b_map"])
    w_kv_oth, b_kv_oth = fold_kv(f["w_oth"], f["b_oth"])
    w_pe_prj = f["w_pe"] @ f["w_prj"]                      # (160, 128)
    b_pe_prj = f["b_pe"] @ f["w_prj"] + f["b_prj"]
    w_kv_prd, b_kv_prd = fold_kv(w_pe_prj, b_pe_prj)       # (160, 256)

    # Block-diagonal head-sum (only first HEADS columns nonzero), attention
    # scale folded in; head_exp (unscaled transpose) expands per-head probs
    # back to 128 lanes.
    lane = jnp.arange(EMBED)
    head_sum = (lane[:, None] // HEAD_DIM == lane[None, :]).astype(jnp.float32)
    head_sum_scaled = head_sum * (1.0 / (HEAD_DIM ** 0.5))
    head_exp = head_sum.T

    # Fused decoders.
    w1p, b1p, gp, betap, w2p, b2p = params["prob_dec"]
    w1a, b1a, ga, betaa, w2a, b2a = params["anchor_dec"]
    w_dec1 = jnp.concatenate([w1p, w1a], axis=1)           # (128, 512)
    ln_dec = jnp.concatenate([
        jnp.concatenate([b1p, b1a], axis=1),
        jnp.concatenate([gp, ga], axis=1),
        jnp.concatenate([betap, betaa], axis=1)], axis=0)  # (3, 512)
    w_dec2 = jnp.zeros((2 * HIDDEN, 2 * EMBED), jnp.float32)
    w_dec2 = w_dec2.at[:HIDDEN, :NUM_MODES].set(w2p)
    w_dec2 = w_dec2.at[HIDDEN:, EMBED:EMBED + NUM_MODES].set(w2a)
    b_dec2 = jnp.zeros((1, 2 * EMBED), jnp.float32)
    b_dec2 = b_dec2.at[:, :NUM_MODES].set(b2p)
    b_dec2 = b_dec2.at[:, EMBED:EMBED + NUM_MODES].set(b2a)

    return {
        "w_qo": jnp.stack([f["w_q"], f["w_o"]]).astype(bf16),        # (2,128,128)
        "b_qo": jnp.concatenate([f["b_q"], f["b_o"]], axis=0),       # (2,128) f32
        "w_kv_mo": jnp.stack([w_kv_map, w_kv_oth]).astype(bf16),     # (2,128,256)
        "w_kv_prd": w_kv_prd.astype(bf16),                           # (160,256)
        "b_kv": jnp.concatenate([b_kv_map, b_kv_oth, b_kv_prd], 0),  # (3,256) f32
        "head_sum": head_sum_scaled,                                 # (128,128) f32
        "head_exp": head_exp,                                        # (128,128) f32
        "w_dec1": w_dec1.astype(bf16),                               # (128,512)
        "ln_dec": ln_dec,                                            # (3,512) f32
        "w_dec2": w_dec2.astype(bf16),                               # (512,256)
        "b_dec2": b_dec2,                                            # (1,256) f32
    }


# ----------------------------------------------------------------------------
# DiffusionModelv2 forward (training-branch semantics without the external
# DDIM scheduler / 1D-UNet, which are not part of the provided module).
# ----------------------------------------------------------------------------
def diffusion_modelv2_forward(packed, ego, map_feat, other_feat,
                              traj_anchors, prediction, target):
    global_feature, probability, anchor_prob = fused_fusion_and_decoders(
        packed, ego, map_feat, other_feat, prediction)

    # target -> [x, y, cos(heading), sin(heading)]
    heading = target[..., 2]
    target_traj = jnp.concatenate(
        [target[..., :2],
         jnp.stack([jnp.cos(heading), jnp.sin(heading)], axis=-1)], axis=-1)

    # anchor matching: mean L2 distance over time, argmin over modes
    diff = target_traj[:, None, :, :2] - traj_anchors[..., :2]     # (bs, modes, T, 2)
    dist = jnp.sqrt(jnp.sum(diff * diff, axis=-1)).mean(axis=-1)   # (bs, modes)
    mode_idx = jnp.argmin(dist, axis=-1)                           # (bs,)

    # anchor_cls_loss = F.cross_entropy(anchor_prob, mode_idx)
    logz = jax.nn.logsumexp(anchor_prob, axis=-1)
    picked = jnp.take_along_axis(anchor_prob, mode_idx[:, None], axis=1)[:, 0]
    anchor_cls_loss = jnp.mean(logz - picked)

    # TODO(synk): DDIMScheduler.add_noise/step and ConditionalUnet1D (noise_pred_net)
    # are external dependencies not included with this module; traj_pred and the
    # smooth-L1 regression loss against the best mode are therefore omitted.
    return global_feature, probability, anchor_prob, anchor_cls_loss


# ----------------------------------------------------------------------------
# Pure-JAX reference (unfolded f32 weights) for a correctness sanity check.
# ----------------------------------------------------------------------------
def _reference_forward(params, ego, map_feat, other_feat, prediction):
    f = params["fusion"]
    bs, N = prediction.shape[:2]
    pf = prediction.reshape(bs, N, -1)
    pred_feat = pf @ f["w_pe"] + f["b_pe"]
    mp = map_feat @ f["w_map"] + f["b_map"]
    ot = other_feat @ f["w_oth"] + f["b_oth"]
    pr = pred_feat @ f["w_prj"] + f["b_prj"]
    ctx = jnp.concatenate([mp, ot, pr], axis=1)
    q = ego.reshape(bs, EMBED) @ f["w_q"] + f["b_q"]
    k = ctx @ f["w_k"] + f["b_k"]
    v = ctx @ f["w_v"] + f["b_v"]
    qh = q.reshape(bs, HEADS, HEAD_DIM)
    kh = k.reshape(bs, -1, HEADS, HEAD_DIM)
    vh = v.reshape(bs, -1, HEADS, HEAD_DIM)
    s = jnp.einsum("bhd,bkhd->bhk", qh, kh) / (HEAD_DIM ** 0.5)
    p = jax.nn.softmax(s, axis=-1)
    attn = jnp.einsum("bhk,bkhd->bhd", p, vh).reshape(bs, EMBED)
    gf = attn @ f["w_o"] + f["b_o"]

    def dec(d, x):
        w1, b1, g, beta, w2, b2 = d
        h = x @ w1 + b1
        mu = h.mean(-1, keepdims=True)
        var = ((h - mu) ** 2).mean(-1, keepdims=True)
        h = (h - mu) * jax.lax.rsqrt(var + 1e-5) * g + beta
        h = jnp.maximum(h, 0.0)
        return h @ w2 + b2

    return gf, dec(params["prob_dec"], gf), dec(params["anchor_dec"], gf)


if __name__ == "__main__":
    key = jax.random.PRNGKey(0)
    pkey, k1, k2, k3, k4, k5, k6 = jax.random.split(key, 7)

    bs = 2
    num_map_tokens = 16
    num_other_tokens = 8
    num_agents = 8

    params = init_params(pkey)
    packed = pack_params(params)

    ego = jax.random.normal(k1, (bs, 1, EMBED), jnp.float32)
    map_feat = jax.random.normal(k2, (bs, num_map_tokens, EMBED), jnp.float32)
    other_feat = jax.random.normal(k3, (bs, num_other_tokens, EMBED), jnp.float32)
    prediction = jax.random.normal(k4, (bs, num_agents, FUTURE_STEPS, 2), jnp.float32)
    traj_anchors = jax.random.normal(k5, (bs, NUM_MODES, FUTURE_STEPS, 4), jnp.float32)
    target = jax.random.normal(k6, (bs, FUTURE_STEPS, 3), jnp.float32)

    fwd = jax.jit(diffusion_modelv2_forward)
    outs = fwd(packed, ego, map_feat, other_feat, traj_anchors, prediction, target)
    outs = jax.block_until_ready(outs)

    gf, prob, aprob, acls = outs
    assert gf.shape == (bs, EMBED)
    assert prob.shape == (bs, NUM_MODES)
    assert aprob.shape == (bs, NUM_MODES)
    assert acls.shape == ()

    # numerical sanity check against a pure-JAX f32 reference (unfolded
    # weights); tolerance loosened for bf16 activations/weights in the kernel.
    ref_gf, ref_prob, ref_anc = _reference_forward(params, ego, map_feat,
                                                   other_feat, prediction)
    assert float(jnp.max(jnp.abs(gf - ref_gf))) < 3e-2
    assert float(jnp.max(jnp.abs(prob - ref_prob))) < 3e-2
    assert float(jnp.max(jnp.abs(aprob - ref_anc))) < 3e-2

    print("KERNEL_OK")
</pallas_src>

<mosaic_0001>
module attributes {stable_mosaic.version = 11 : i64} {
  func.func @_fused_kernel(%arg0: i32, %arg1: memref<2x128xbf16, #tpu.memory_space<vmem>>, %arg2: memref<2x16x128xbf16, #tpu.memory_space<vmem>>, %arg3: memref<2x8x128xbf16, #tpu.memory_space<vmem>>, %arg4: memref<2x8x160xbf16, #tpu.memory_space<vmem>>, %arg5: memref<2x128x128xbf16, #tpu.memory_space<vmem>>, %arg6: memref<2x128x256xbf16, #tpu.memory_space<vmem>>, %arg7: memref<160x256xbf16, #tpu.memory_space<vmem>>, %arg8: memref<3x256xf32, #tpu.memory_space<vmem>>, %arg9: memref<2x128xf32, #tpu.memory_space<vmem>>, %arg10: memref<128x128xf32, #tpu.memory_space<vmem>>, %arg11: memref<128x128xf32, #tpu.memory_space<vmem>>, %arg12: memref<128x512xbf16, #tpu.memory_space<vmem>>, %arg13: memref<3x512xf32, #tpu.memory_space<vmem>>, %arg14: memref<512x256xbf16, #tpu.memory_space<vmem>>, %arg15: memref<1x256xf32, #tpu.memory_space<vmem>>, %arg16: memref<2x128xf32, #tpu.memory_space<vmem>>, %arg17: memref<2x256xf32, #tpu.memory_space<vmem>>) attributes {dimension_semantics = [#tpu.dimension_semantics<parallel>], iteration_bounds = array<i64: 1>, scalar_prefetch = 0 : i64, scratch_operands = 0 : i64, tpu.core_type = #tpu.core_type<tc>, window_params = [{transform_indices = @transform_0, window_bounds = array<i64: 2, 128>}, {transform_indices = @transform_1, window_bounds = array<i64: 2, 16, 128>}, {transform_indices = @transform_2, window_bounds = array<i64: 2, 8, 128>}, {transform_indices = @transform_3, window_bounds = array<i64: 2, 8, 160>}, {pipeline_mode = #tpu.pipeline_mode<synchronous>, transform_indices = @transform_4, window_bounds = array<i64: 2, 128, 128>}, {pipeline_mode = #tpu.pipeline_mode<synchronous>, transform_indices = @transform_5, window_bounds = array<i64: 2, 128, 256>}, {pipeline_mode = #tpu.pipeline_mode<synchronous>, transform_indices = @transform_6, window_bounds = array<i64: 160, 256>}, {pipeline_mode = #tpu.pipeline_mode<synchronous>, transform_indices = @transform_7, window_bounds = array<i64: 3, 256>}, {pipeline_mode = #tpu.pipeline_mode<synchronous>, transform_indices = @transform_8, window_bounds = array<i64: 2, 128>}, {pipeline_mode = #tpu.pipeline_mode<synchronous>, transform_indices = @transform_9, window_bounds = array<i64: 128, 128>}, {pipeline_mode = #tpu.pipeline_mode<synchronous>, transform_indices = @transform_10, window_bounds = array<i64: 128, 128>}, {pipeline_mode = #tpu.pipeline_mode<synchronous>, transform_indices = @transform_11, window_bounds = array<i64: 128, 512>}, {pipeline_mode = #tpu.pipeline_mode<synchronous>, transform_indices = @transform_12, window_bounds = array<i64: 3, 512>}, {pipeline_mode = #tpu.pipeline_mode<synchronous>, transform_indices = @transform_13, window_bounds = array<i64: 512, 256>}, {pipeline_mode = #tpu.pipeline_mode<synchronous>, transform_indices = @transform_14, window_bounds = array<i64: 1, 256>}, {transform_indices = @transform_15, window_bounds = array<i64: 2, 128>}, {transform_indices = @transform_16, window_bounds = array<i64: 2, 256>}]} {
    %c0 = arith.constant 0 : index
    %c0_0 = arith.constant 0 : index
    %0 = vector.load %arg1[%c0, %c0_0] : memref<2x128xbf16, #tpu.memory_space<vmem>>, vector<2x128xbf16>
    %c0_1 = arith.constant 0 : index
    %c0_2 = arith.constant 0 : index
    %c0_3 = arith.constant 0 : index
    %1 = vector.load %arg5[%c0_1, %c0_2, %c0_3] : memref<2x128x128xbf16, #tpu.memory_space<vmem>>, vector<1x128x128xbf16>
    %2 = vector.shape_cast %1 : vector<1x128x128xbf16> to vector<128x128xbf16>
    %cst = arith.constant dense<0.000000e+00> : vector<2x128xf32>
    %3 = tpu.matmul %0, %2, %cst {dimension_numbers = #tpu.dot_dimension_numbers<[1], [0], [0], [1], [0, 0, 1, 1], [], []>} : vector<2x128xbf16>, vector<128x128xbf16>, vector<2x128xf32> -> vector<2x128xf32>
    %c0_4 = arith.constant 0 : index
    %c0_5 = arith.constant 0 : index
    %4 = vector.load %arg9[%c0_4, %c0_5] : memref<2x128xf32, #tpu.memory_space<vmem>>, vector<1x128xf32>
    %5 = vector.broadcast %4 : vector<1x128xf32> to vector<2x128xf32>
    %6 = arith.addf %3, %5 : vector<2x128xf32>
    %7 = vector.shape_cast %6 : vector<2x128xf32> to vector<2x1x128xf32>
    %c0_6 = arith.constant 0 : index
    %c0_7 = arith.constant 0 : index
    %8 = vector.load %arg10[%c0_6, %c0_7] : memref<128x128xf32, #tpu.memory_space<vmem>>, vector<128x128xf32>
    %c0_8 = arith.constant 0 : index
    %c0_9 = arith.constant 0 : index
    %9 = vector.load %arg11[%c0_8, %c0_9] : memref<128x128xf32, #tpu.memory_space<vmem>>, vector<128x128xf32>
    %c0_10 = arith.constant 0 : index
    %c0_11 = arith.constant 0 : index
    %c0_12 = arith.constant 0 : index
    %10 = vector.load %arg6[%c0_10, %c0_11, %c0_12] : memref<2x128x256xbf16, #tpu.memory_space<vmem>>, vector<1x128x256xbf16>
    %11 = vector.shape_cast %10 : vector<1x128x256xbf16> to vector<128x256xbf16>
    %c0_13 = arith.constant 0 : index
    %c0_14 = arith.constant 0 : index
    %12 = vector.load %arg8[%c0_13, %c0_14] : memref<3x256xf32, #tpu.memory_space<vmem>>, vector<1x256xf32>
    %c0_15 = arith.constant 0 : index
    %c0_16 = arith.constant 0 : index
    %c0_17 = arith.constant 0 : index
    %13 = vector.load %arg2[%c0_15, %c0_16, %c0_17] : memref<2x16x128xbf16, #tpu.memory_space<vmem>>, vector<2x16x128xbf16>
    %14 = vector.shape_cast %13 : vector<2x16x128xbf16> to vector<32x128xbf16>
    %cst_18 = arith.constant dense<0.000000e+00> : vector<32x256xf32>
    %15 = tpu.matmul %14, %11, %cst_18 {dimension_numbers = #tpu.dot_dimension_numbers<[1], [0], [0], [1], [0, 0, 1, 1], [], []>} : vector<32x128xbf16>, vector<128x256xbf16>, vector<32x256xf32> -> vector<32x256xf32>
    %16 = vector.broadcast %12 : vector<1x256xf32> to vector<32x256xf32>
    %17 = arith.addf %15, %16 : vector<32x256xf32>
    %18 = vector.shape_cast %17 : vector<32x256xf32> to vector<2x16x256xf32>
    %19 = vector.extract_strided_slice %18 {offsets = [0, 0, 0], sizes = [2, 16, 128], strides = [1, 1, 1]} : vector<2x16x256xf32> to vector<2x16x128xf32>
    %20 = vector.extract_strided_slice %18 {offsets = [0, 0, 128], sizes = [2, 16, 128], strides = [1, 1, 1]} : vector<2x16x256xf32> to vector<2x16x128xf32>
    %21 = vector.broadcast %7 : vector<2x1x128xf32> to vector<2x16x128xf32>
    %22 = arith.mulf %19, %21 : vector<2x16x128xf32>
    %23 = vector.shape_cast %22 : vector<2x16x128xf32> to vector<32x128xf32>
    %cst_19 = arith.constant dense<0.000000e+00> : vector<32x128xf32>
    %24 = tpu.matmul %23, %8, %cst_19 {dimension_numbers = #tpu.dot_dimension_numbers<[1], [0], [0], [1], [0, 0, 1, 1], [], []>} : vector<32x128xf32>, vector<128x128xf32>, vector<32x128xf32> -> vector<32x128xf32>
    %25 = vector.shape_cast %24 : vector<32x128xf32> to vector<2x16x128xf32>
    %c1 = arith.constant 1 : index
    %c0_20 = arith.constant 0 : index
    %c0_21 = arith.constant 0 : index
    %26 = vector.load %arg6[%c1, %c0_20, %c0_21] : memref<2x128x256xbf16, #tpu.memory_space<vmem>>, vector<1x128x256xbf16>
    %27 = vector.shape_cast %26 : vector<1x128x256xbf16> to vector<128x256xbf16>
    %c1_22 = arith.constant 1 : index
    %c0_23 = arith.constant 0 : index
    %28 = vector.load %arg8[%c1_22, %c0_23] : memref<3x256xf32, #tpu.memory_space<vmem>>, vector<1x256xf32>
    %c0_24 = arith.constant 0 : index
    %c0_25 = arith.constant 0 : index
    %c0_26 = arith.constant 0 : index
    %29 = vector.load %arg3[%c0_24, %c0_25, %c0_26] : memref<2x8x128xbf16, #tpu.memory_space<vmem>>, vector<2x8x128xbf16>
    %30 = vector.shape_cast %29 : vector<2x8x128xbf16> to vector<16x128xbf16>
    %cst_27 = arith.constant dense<0.000000e+00> : vector<16x256xf32>
    %31 = tpu.matmul %30, %27, %cst_27 {dimension_numbers = #tpu.dot_dimension_numbers<[1], [0], [0], [1], [0, 0, 1, 1], [], []>} : vector<16x128xbf16>, vector<128x256xbf16>, vector<16x256xf32> -> vector<16x256xf32>
    %32 = vector.broadcast %28 : vector<1x256xf32> to vector<16x256xf32>
    %33 = arith.addf %31, %32 : vector<16x256xf32>
    %34 = vector.shape_cast %33 : vector<16x256xf32> to vector<2x8x256xf32>
    %35 = vector.extract_strided_slice %34 {offsets = [0, 0, 0], sizes = [2, 8, 128], strides = [1, 1, 1]} : vector<2x8x256xf32> to vector<2x8x128xf32>
    %36 = vector.extract_strided_slice %34 {offsets = [0, 0, 128], sizes = [2, 8, 128], strides = [1, 1, 1]} : vector<2x8x256xf32> to vector<2x8x128xf32>
    %37 = vector.broadcast %7 : vector<2x1x128xf32> to vector<2x8x128xf32>
    %38 = arith.mulf %35, %37 : vector<2x8x128xf32>
    %39 = vector.shape_cast %38 : vector<2x8x128xf32> to vector<16x128xf32>
    %cst_28 = arith.constant dense<0.000000e+00> : vector<16x128xf32>
    %40 = tpu.matmul %39, %8, %cst_28 {dimension_numbers = #tpu.dot_dimension_numbers<[1], [0], [0], [1], [0, 0, 1, 1], [], []>} : vector<16x128xf32>, vector<128x128xf32>, vector<16x128xf32> -> vector<16x128xf32>
    %41 = vector.shape_cast %40 : vector<16x128xf32> to vector<2x8x128xf32>
    %c0_29 = arith.constant 0 : index
    %c0_30 = arith.constant 0 : index
    %42 = vector.load %arg7[%c0_29, %c0_30] : memref<160x256xbf16, #tpu.memory_space<vmem>>, vector<160x256xbf16>
    %c2 = arith.constant 2 : index
    %c0_31 = arith.constant 0 : index
    %43 = vector.load %arg8[%c2, %c0_31] : memref<3x256xf32, #tpu.memory_space<vmem>>, vector<1x256xf32>
    %c0_32 = arith.constant 0 : index
    %c0_33 = arith.constant 0 : index
    %c0_34 = arith.constant 0 : index
    %44 = vector.load %arg4[%c0_32, %c0_33, %c0_34] : memref<2x8x160xbf16, #tpu.memory_space<vmem>>, vector<2x8x160xbf16>
    %45 = vector.shape_cast %44 : vector<2x8x160xbf16> to vector<16x160xbf16>
    %cst_35 = arith.constant dense<0.000000e+00> : vector<16x256xf32>
    %46 = tpu.matmul %45, %42, %cst_35 {dimension_numbers = #tpu.dot_dimension_numbers<[1], [0], [0], [1], [0, 0, 1, 1], [], []>} : vector<16x160xbf16>, vector<160x256xbf16>, vector<16x256xf32> -> vector<16x256xf32>
    %47 = vector.broadcast %43 : vector<1x256xf32> to vector<16x256xf32>
    %48 = arith.addf %46, %47 : vector<16x256xf32>
    %49 = vector.shape_cast %48 : vector<16x256xf32> to vector<2x8x256xf32>
    %50 = vector.extract_strided_slice %49 {offsets = [0, 0, 0], sizes = [2, 8, 128], strides = [1, 1, 1]} : vector<2x8x256xf32> to vector<2x8x128xf32>
    %51 = vector.extract_strided_slice %49 {offsets = [0, 0, 128], sizes = [2, 8, 128], strides = [1, 1, 1]} : vector<2x8x256xf32> to vector<2x8x128xf32>
    %52 = vector.broadcast %7 : vector<2x1x128xf32> to vector<2x8x128xf32>
    %53 = arith.mulf %50, %52 : vector<2x8x128xf32>
    %54 = vector.shape_cast %53 : vector<2x8x128xf32> to vector<16x128xf32>
    %cst_36 = arith.constant dense<0.000000e+00> : vector<16x128xf32>
    %55 = tpu.matmul %54, %8, %cst_36 {dimension_numbers = #tpu.dot_dimension_numbers<[1], [0], [0], [1], [0, 0, 1, 1], [], []>} : vector<16x128xf32>, vector<128x128xf32>, vector<16x128xf32> -> vector<16x128xf32>
    %56 = vector.shape_cast %55 : vector<16x128xf32> to vector<2x8x128xf32>
    %cst_37 = arith.constant dense<0xFF800000> : vector<2x128xf32>
    %57 = vector.multi_reduction <maximumf>, %25, %cst_37 [1] : vector<2x16x128xf32> to vector<2x128xf32>
    %58 = vector.shape_cast %57 : vector<2x128xf32> to vector<2x1x128xf32>
    %cst_38 = arith.constant dense<0xFF800000> : vector<2x128xf32>
    %59 = vector.multi_reduction <maximumf>, %41, %cst_38 [1] : vector<2x8x128xf32> to vector<2x128xf32>
    %60 = vector.shape_cast %59 : vector<2x128xf32> to vector<2x1x128xf32>
    %61 = arith.maximumf %58, %60 : vector<2x1x128xf32>
    %cst_39 = arith.constant dense<0xFF800000> : vector<2x128xf32>
    %62 = vector.multi_reduction <maximumf>, %56, %cst_39 [1] : vector<2x8x128xf32> to vector<2x128xf32>
    %63 = vector.shape_cast %62 : vector<2x128xf32> to vector<2x1x128xf32>
    %64 = arith.maximumf %61, %63 : vector<2x1x128xf32>
    %65 = vector.broadcast %64 : vector<2x1x128xf32> to vector<2x16x128xf32>
    %66 = arith.subf %25, %65 : vector<2x16x128xf32>
    %67 = math.exp %66 : vector<2x16x128xf32>
    %68 = vector.shape_cast %67 : vector<2x16x128xf32> to vector<32x128xf32>
    %cst_40 = arith.constant dense<0.000000e+00> : vector<32x128xf32>
    %69 = tpu.matmul %68, %9, %cst_40 {dimension_numbers = #tpu.dot_dimension_numbers<[1], [0], [0], [1], [0, 0, 1, 1], [], []>} : vector<32x128xf32>, vector<128x128xf32>, vector<32x128xf32> -> vector<32x128xf32>
    %70 = vector.shape_cast %69 : vector<32x128xf32> to vector<2x16x128xf32>
    %71 = arith.mulf %70, %20 : vector<2x16x128xf32>
    %cst_41 = arith.constant dense<0.000000e+00> : vector<2x128xf32>
    %72 = vector.multi_reduction <add>, %71, %cst_41 [1] : vector<2x16x128xf32> to vector<2x128xf32>
    %cst_42 = arith.constant dense<0.000000e+00> : vector<2x128xf32>
    %73 = vector.multi_reduction <add>, %70, %cst_42 [1] : vector<2x16x128xf32> to vector<2x128xf32>
    %74 = vector.broadcast %64 : vector<2x1x128xf32> to vector<2x8x128xf32>
    %75 = arith.subf %41, %74 : vector<2x8x128xf32>
    %76 = math.exp %75 : vector<2x8x128xf32>
    %77 = vector.shape_cast %76 : vector<2x8x128xf32> to vector<16x128xf32>
    %cst_43 = arith.constant dense<0.000000e+00> : vector<16x128xf32>
    %78 = tpu.matmul %77, %9, %cst_43 {dimension_numbers = #tpu.dot_dimension_numbers<[1], [0], [0], [1], [0, 0, 1, 1], [], []>} : vector<16x128xf32>, vector<128x128xf32>, vector<16x128xf32> -> vector<16x128xf32>
    %79 = vector.shape_cast %78 : vector<16x128xf32> to vector<2x8x128xf32>
    %80 = arith.mulf %79, %36 : vector<2x8x128xf32>
    %cst_44 = arith.constant dense<0.000000e+00> : vector<2x128xf32>
    %81 = vector.multi_reduction <add>, %80, %cst_44 [1] : vector<2x8x128xf32> to vector<2x128xf32>
    %cst_45 = arith.constant dense<0.000000e+00> : vector<2x128xf32>
    %82 = vector.multi_reduction <add>, %79, %cst_45 [1] : vector<2x8x128xf32> to vector<2x128xf32>
    %83 = vector.broadcast %64 : vector<2x1x128xf32> to vector<2x8x128xf32>
    %84 = arith.subf %56, %83 : vector<2x8x128xf32>
    %85 = math.exp %84 : vector<2x8x128xf32>
    %86 = vector.shape_cast %85 : vector<2x8x128xf32> to vector<16x128xf32>
    %cst_46 = arith.constant dense<0.000000e+00> : vector<16x128xf32>
    %87 = tpu.matmul %86, %9, %cst_46 {dimension_numbers = #tpu.dot_dimension_numbers<[1], [0], [0], [1], [0, 0, 1, 1], [], []>} : vector<16x128xf32>, vector<128x128xf32>, vector<16x128xf32> -> vector<16x128xf32>
    %88 = vector.shape_cast %87 : vector<16x128xf32> to vector<2x8x128xf32>
    %89 = arith.mulf %88, %51 : vector<2x8x128xf32>
    %cst_47 = arith.constant dense<0.000000e+00> : vector<2x128xf32>
    %90 = vector.multi_reduction <add>, %89, %cst_47 [1] : vector<2x8x128xf32> to vector<2x128xf32>
    %cst_48 = arith.constant dense<0.000000e+00> : vector<2x128xf32>
    %91 = vector.multi_reduction <add>, %88, %cst_48 [1] : vector<2x8x128xf32> to vector<2x128xf32>
    %92 = arith.addf %72, %81 : vector<2x128xf32>
    %93 = arith.addf %92, %90 : vector<2x128xf32>
    %94 = arith.addf %73, %82 : vector<2x128xf32>
    %95 = arith.addf %94, %91 : vector<2x128xf32>
    %96 = tpu.reciprocal %95 {approx = true} : vector<2x128xf32> -> vector<2x128xf32>
    %97 = arith.mulf %93, %96 : vector<2x128xf32>
    %98 = arith.truncf %97 : vector<2x128xf32> to vector<2x128xbf16>
    %c1_49 = arith.constant 1 : index
    %c0_50 = arith.constant 0 : index
    %c0_51 = arith.constant 0 : index
    %99 = vector.load %arg5[%c1_49, %c0_50, %c0_51] : memref<2x128x128xbf16, #tpu.memory_space<vmem>>, vector<1x128x128xbf16>
    %100 = vector.shape_cast %99 : vector<1x128x128xbf16> to vector<128x128xbf16>
    %cst_52 = arith.constant dense<0.000000e+00> : vector<2x128xf32>
    %101 = tpu.matmul %98, %100, %cst_52 {dimension_numbers = #tpu.dot_dimension_numbers<[1], [0], [0], [1], [0, 0, 1, 1], [], []>} : vector<2x128xbf16>, vector<128x128xbf16>, vector<2x128xf32> -> vector<2x128xf32>
    %c1_53 = arith.constant 1 : index
    %c0_54 = arith.constant 0 : index
    %102 = vector.load %arg9[%c1_53, %c0_54] : memref<2x128xf32, #tpu.memory_space<vmem>>, vector<1x128xf32>
    %103 = vector.broadcast %102 : vector<1x128xf32> to vector<2x128xf32>
    %104 = arith.addf %101, %103 : vector<2x128xf32>
    %c0_55 = arith.constant 0 : index
    %c0_56 = arith.constant 0 : index
    %105 = vector.load %arg16[%c0_55, %c0_56] : memref<2x128xf32, #tpu.memory_space<vmem>>, vector<2x128xf32>
    tpu.vector_store %arg16[%c0_55, %c0_56], %104 {strides = array<i32>} : memref<2x128xf32, #tpu.memory_space<vmem>>, vector<2x128xf32>,
    %106 = arith.truncf %104 : vector<2x128xf32> to vector<2x128xbf16>
    %c0_57 = arith.constant 0 : index
    %c0_58 = arith.constant 0 : index
    %107 = vector.load %arg12[%c0_57, %c0_58] : memref<128x512xbf16, #tpu.memory_space<vmem>>, vector<128x512xbf16>
    %cst_59 = arith.constant dense<0.000000e+00> : vector<2x512xf32>
    %108 = tpu.matmul %106, %107, %cst_59 {dimension_numbers = #tpu.dot_dimension_numbers<[1], [0], [0], [1], [0, 0, 1, 1], [], []>} : vector<2x128xbf16>, vector<128x512xbf16>, vector<2x512xf32> -> vector<2x512xf32>
    %c0_60 = arith.constant 0 : index
    %c0_61 = arith.constant 0 : index
    %109 = vector.load %arg13[%c0_60, %c0_61] : memref<3x512xf32, #tpu.memory_space<vmem>>, vector<1x512xf32>
    %110 = vector.broadcast %109 : vector<1x512xf32> to vector<2x512xf32>
    %111 = arith.addf %108, %110 : vector<2x512xf32>
    %112 = vector.extract_strided_slice %111 {offsets = [0, 0], sizes = [2, 256], strides = [1, 1]} : vector<2x512xf32> to vector<2x256xf32>
    %c1_62 = arith.constant 1 : index
    %c0_63 = arith.constant 0 : index
    %113 = vector.load %arg13[%c1_62, %c0_63] : memref<3x512xf32, #tpu.memory_space<vmem>>, vector<1x256xf32>
    %c2_64 = arith.constant 2 : index
    %c0_65 = arith.constant 0 : index
    %114 = vector.load %arg13[%c2_64, %c0_65] : memref<3x512xf32, #tpu.memory_space<vmem>>, vector<1x256xf32>
    %cst_66 = arith.constant dense<0.000000e+00> : vector<2xf32>
    %115 = vector.multi_reduction <add>, %112, %cst_66 [1] : vector<2x256xf32> to vector<2xf32>
    %116 = vector.shape_cast %115 : vector<2xf32> to vector<2x1xf32>
    %cst_67 = arith.constant 2.560000e+02 : f32
    %117 = vector.broadcast %cst_67 : f32 to vector<2x1xf32>
    %118 = arith.divf %116, %117 : vector<2x1xf32>
    %119 = vector.broadcast %118 : vector<2x1xf32> to vector<2x256xf32>
    %120 = arith.subf %112, %119 : vector<2x256xf32>
    %121 = arith.mulf %120, %120 : vector<2x256xf32>
    %cst_68 = arith.constant dense<0.000000e+00> : vector<2xf32>
    %122 = vector.multi_reduction <add>, %121, %cst_68 [1] : vector<2x256xf32> to vector<2xf32>
    %123 = vector.shape_cast %122 : vector<2xf32> to vector<2x1xf32>
    %cst_69 = arith.constant 2.560000e+02 : f32
    %124 = vector.broadcast %cst_69 : f32 to vector<2x1xf32>
    %125 = arith.divf %123, %124 : vector<2x1xf32>
    %126 = vector.broadcast %118 : vector<2x1xf32> to vector<2x256xf32>
    %127 = arith.subf %112, %126 : vector<2x256xf32>
    %cst_70 = arith.constant 9.99999974E-6 : f32
    %128 = vector.broadcast %cst_70 : f32 to vector<2x1xf32>
    %129 = arith.addf %125, %128 : vector<2x1xf32>
    %130 = math.rsqrt %129 : vector<2x1xf32>
    %131 = vector.broadcast %130 : vector<2x1xf32> to vector<2x256xf32>
    %132 = arith.mulf %127, %131 : vector<2x256xf32>
    %133 = vector.broadcast %113 : vector<1x256xf32> to vector<2x256xf32>
    %134 = arith.mulf %132, %133 : vector<2x256xf32>
    %135 = vector.broadcast %114 : vector<1x256xf32> to vector<2x256xf32>
    %136 = arith.addf %134, %135 : vector<2x256xf32>
    %cst_71 = arith.constant 0.000000e+00 : f32
    %137 = vector.broadcast %cst_71 : f32 to vector<2x256xf32>
    %138 = arith.maximumf %136, %137 : vector<2x256xf32>
    %139 = vector.extract_strided_slice %111 {offsets = [0, 256], sizes = [2, 256], strides = [1, 1]} : vector<2x512xf32> to vector<2x256xf32>
    %c1_72 = arith.constant 1 : index
    %c256 = arith.constant 256 : index
    %140 = vector.load %arg13[%c1_72, %c256] : memref<3x512xf32, #tpu.memory_space<vmem>>, vector<1x256xf32>
    %c2_73 = arith.constant 2 : index
    %c256_74 = arith.constant 256 : index
    %141 = vector.load %arg13[%c2_73, %c256_74] : memref<3x512xf32, #tpu.memory_space<vmem>>, vector<1x256xf32>
    %cst_75 = arith.constant dense<0.000000e+00> : vector<2xf32>
    %142 = vector.multi_reduction <add>, %139, %cst_75 [1] : vector<2x256xf32> to vector<2xf32>
    %143 = vector.shape_cast %142 : vector<2xf32> to vector<2x1xf32>
    %cst_76 = arith.constant 2.560000e+02 : f32
    %144 = vector.broadcast %cst_76 : f32 to vector<2x1xf32>
    %145 = arith.divf %143, %144 : vector<2x1xf32>
    %146 = vector.broadcast %145 : vector<2x1xf32> to vector<2x256xf32>
    %147 = arith.subf %139, %146 : vector<2x256xf32>
    %148 = arith.mulf %147, %147 : vector<2x256xf32>
    %cst_77 = arith.constant dense<0.000000e+00> : vector<2xf32>
    %149 = vector.multi_reduction <add>, %148, %cst_77 [1] : vector<2x256xf32> to vector<2xf32>
    %150 = vector.shape_cast %149 : vector<2xf32> to vector<2x1xf32>
    %cst_78 = arith.constant 2.560000e+02 : f32
    %151 = vector.broadcast %cst_78 : f32 to vector<2x1xf32>
    %152 = arith.divf %150, %151 : vector<2x1xf32>
    %153 = vector.broadcast %145 : vector<2x1xf32> to vector<2x256xf32>
    %154 = arith.subf %139, %153 : vector<2x256xf32>
    %cst_79 = arith.constant 9.99999974E-6 : f32
    %155 = vector.broadcast %cst_79 : f32 to vector<2x1xf32>
    %156 = arith.addf %152, %155 : vector<2x1xf32>
    %157 = math.rsqrt %156 : vector<2x1xf32>
    %158 = vector.broadcast %157 : vector<2x1xf32> to vector<2x256xf32>
    %159 = arith.mulf %154, %158 : vector<2x256xf32>
    %160 = vector.broadcast %140 : vector<1x256xf32> to vector<2x256xf32>
    %161 = arith.mulf %159, %160 : vector<2x256xf32>
    %162 = vector.broadcast %141 : vector<1x256xf32> to vector<2x256xf32>
    %163 = arith.addf %161, %162 : vector<2x256xf32>
    %cst_80 = arith.constant 0.000000e+00 : f32
    %164 = vector.broadcast %cst_80 : f32 to vector<2x256xf32>
    %165 = arith.maximumf %163, %164 : vector<2x256xf32>
    %166 = tpu.concatenate %138, %165 in 1 : vector<2x256xf32>, vector<2x256xf32> -> vector<2x512xf32>
    %167 = arith.truncf %166 : vector<2x512xf32> to vector<2x512xbf16>
    %c0_81 = arith.constant 0 : index
    %c0_82 = arith.constant 0 : index
    %168 = vector.load %arg14[%c0_81, %c0_82] : memref<512x256xbf16, #tpu.memory_space<vmem>>, vector<512x256xbf16>
    %cst_83 = arith.constant dense<0.000000e+00> : vector<2x256xf32>
    %169 = tpu.matmul %167, %168, %cst_83 {dimension_numbers = #tpu.dot_dimension_numbers<[1], [0], [0], [1], [0, 0, 1, 1], [], []>} : vector<2x512xbf16>, vector<512x256xbf16>, vector<2x256xf32> -> vector<2x256xf32>
    %c0_84 = arith.constant 0 : index
    %c0_85 = arith.constant 0 : index
    %170 = vector.load %arg15[%c0_84, %c0_85] : memref<1x256xf32, #tpu.memory_space<vmem>>, vector<1x256xf32>
    %171 = vector.broadcast %170 : vector<1x256xf32> to vector<2x256xf32>
    %172 = arith.addf %169, %171 : vector<2x256xf32>
    %c0_86 = arith.constant 0 : index
    %c0_87 = arith.constant 0 : index
    %173 = vector.load %arg17[%c0_86, %c0_87] : memref<2x256xf32, #tpu.memory_space<vmem>>, vector<2x256xf32>
    tpu.vector_store %arg17[%c0_86, %c0_87], %172 {strides = array<i32>} : memref<2x256xf32, #tpu.memory_space<vmem>>, vector<2x256xf32>,
    return
  }
  func.func @transform_0(%arg0: i32) -> (i32, i32) {
    %c0_i32 = arith.constant 0 : i32
    %c0_i32_0 = arith.constant 0 : i32
    return %arg0, %c0_i32 : i32, i32
  }
  func.func @transform_1(%arg0: i32) -> (i32, i32, i32) {
    %c0_i32 = arith.constant 0 : i32
    %c0_i32_0 = arith.constant 0 : i32
    %c0_i32_1 = arith.constant 0 : i32
    return %arg0, %c0_i32, %c0_i32_0 : i32, i32, i32
  }
  func.func @transform_2(%arg0: i32) -> (i32, i32, i32) {
    %c0_i32 = arith.constant 0 : i32
    %c0_i32_0 = arith.constant 0 : i32
    %c0_i32_1 = arith.constant 0 : i32
    return %arg0, %c0_i32, %c0_i32_0 : i32, i32, i32
  }
  func.func @transform_3(%arg0: i32) -> (i32, i32, i32) {
    %c0_i32 = arith.constant 0 : i32
    %c0_i32_0 = arith.constant 0 : i32
    %c0_i32_1 = arith.constant 0 : i32
    return %arg0, %c0_i32, %c0_i32_0 : i32, i32, i32
  }
  func.func @transform_4(%arg0: i32) -> (i32, i32, i32) {
    %c0_i32 = arith.constant 0 : i32
    %c0_i32_0 = arith.constant 0 : i32
    %c0_i32_1 = arith.constant 0 : i32
    %c0_i32_2 = arith.constant 0 : i32
    return %c0_i32, %c0_i32_0, %c0_i32_1 : i32, i32, i32
  }
  func.func @transform_5(%arg0: i32) -> (i32, i32, i32) {
    %c0_i32 = arith.constant 0 : i32
    %c0_i32_0 = arith.constant 0 : i32
    %c0_i32_1 = arith.constant 0 : i32
    %c0_i32_2 = arith.constant 0 : i32
    return %c0_i32, %c0_i32_0, %c0_i32_1 : i32, i32, i32
  }
  func.func @transform_6(%arg0: i32) -> (i32, i32) {
    %c0_i32 = arith.constant 0 : i32
    %c0_i32_0 = arith.constant 0 : i32
    %c0_i32_1 = arith.constant 0 : i32
    return %c0_i32, %c0_i32_0 : i32, i32
  }
  func.func @transform_7(%arg0: i32) -> (i32, i32) {
    %c0_i32 = arith.constant 0 : i32
    %c0_i32_0 = arith.constant 0 : i32
    %c0_i32_1 = arith.constant 0 : i32
    return %c0_i32, %c0_i32_0 : i32, i32
  }
  func.func @transform_8(%arg0: i32) -> (i32, i32) {
    %c0_i32 = arith.constant 0 : i32
    %c0_i32_0 = arith.constant 0 : i32
    %c0_i32_1 = arith.constant 0 : i32
    return %c0_i32, %c0_i32_0 : i32, i32
  }
  func.func @transform_9(%arg0: i32) -> (i32, i32) {
    %c0_i32 = arith.constant 0 : i32
    %c0_i32_0 = arith.constant 0 : i32
    %c0_i32_1 = arith.constant 0 : i32
    return %c0_i32, %c0_i32_0 : i32, i32
  }
  func.func @transform_10(%arg0: i32) -> (i32, i32) {
    %c0_i32 = arith.constant 0 : i32
    %c0_i32_0 = arith.constant 0 : i32
    %c0_i32_1 = arith.constant 0 : i32
    return %c0_i32, %c0_i32_0 : i32, i32
  }
  func.func @transform_11(%arg0: i32) -> (i32, i32) {
    %c0_i32 = arith.constant 0 : i32
    %c0_i32_0 = arith.constant 0 : i32
    %c0_i32_1 = arith.constant 0 : i32
    return %c0_i32, %c0_i32_0 : i32, i32
  }
  func.func @transform_12(%arg0: i32) -> (i32, i32) {
    %c0_i32 = arith.constant 0 : i32
    %c0_i32_0 = arith.constant 0 : i32
    %c0_i32_1 = arith.constant 0 : i32
    return %c0_i32, %c0_i32_0 : i32, i32
  }
  func.func @transform_13(%arg0: i32) -> (i32, i32) {
    %c0_i32 = arith.constant 0 : i32
    %c0_i32_0 = arith.constant 0 : i32
    %c0_i32_1 = arith.constant 0 : i32
    return %c0_i32, %c0_i32_0 : i32, i32
  }
  func.func @transform_14(%arg0: i32) -> (i32, i32) {
    %c0_i32 = arith.constant 0 : i32
    %c0_i32_0 = arith.constant 0 : i32
    %c0_i32_1 = arith.constant 0 : i32
    return %c0_i32, %c0_i32_0 : i32, i32
  }
  func.func @transform_15(%arg0: i32) -> (i32, i32) {
    %c0_i32 = arith.constant 0 : i32
    %c0_i32_0 = arith.constant 0 : i32
    return %arg0, %c0_i32 : i32, i32
  }
  func.func @transform_16(%arg0: i32) -> (i32, i32) {
    %c0_i32 = arith.constant 0 : i32
    %c0_i32_0 = arith.constant 0 : i32
    return %arg0, %c0_i32 : i32, i32
  }
}

</mosaic_0001>

<bundles_post_ra>
// kernel: diffusion_modelv2_forward.1
= control target key start
LH: loop header
LB: loop body
LE: loop exit
PB: predicated region body
PF: predicated region fallthrough
CT: control target
= control target key end

     0   :  { %s4393_s0 = inlined_call_operand.vmem [shape: bf16[2,128], index: 0, kind: input, shape index: {}]   ;;  %s4394_s1 = inlined_call_operand.vmem [shape: bf16[2,16,128], index: 1, kind: input, shape index: {}]   ;;  %s4395_s2 = inlined_call_operand.vmem [shape: bf16[2,8,128], index: 2, kind: input, shape index: {}]   ;;  %s4396_s3 = inlined_call_operand.vmem [shape: bf16[2,8,160], index: 3, kind: input, shape index: {}]   ;;  %s4397_s4 = inlined_call_operand.hbm [shape: bf16[2,128,128], index: 4, kind: input, shape index: {}]   ;;  %s4398_s5 = inlined_call_operand.vmem [shape: bf16[2,128,256], index: 5, kind: input, shape index: {}]   ;;  %s4399_s6 = inlined_call_operand.vmem [shape: bf16[160,256], index: 6, kind: input, shape index: {}]   ;;  %s4400_s7 = inlined_call_operand.vmem [shape: f32[3,256], index: 7, kind: input, shape index: {}]   ;;  %s4401_s8 = inlined_call_operand.vmem [shape: f32[2,128], index: 8, kind: input, shape index: {}]   ;;  %s4402_s9 = inlined_call_operand.hbm [shape: f32[128,128], index: 9, kind: input, shape index: {}]   ;;  %s4403_s10 = inlined_call_operand.hbm [shape: f32[128,128], index: 10, kind: input, shape index: {}]   ;;  %s4404_s11 = inlined_call_operand.hbm [shape: bf16[128,512], index: 11, kind: input, shape index: {}]   ;;  %s4405_s12 = inlined_call_operand.vmem [shape: f32[3,512], index: 12, kind: input, shape index: {}]   ;;  %s4406_s13 = inlined_call_operand.hbm [shape: bf16[512,256], index: 13, kind: input, shape index: {}]   ;;  %s4407_s14 = inlined_call_operand.vmem [shape: f32[1,256], index: 14, kind: input, shape index: {}]   ;;  %s4408_s15 = inlined_call_operand.hbm [shape: f32[2,128], index: 15, kind: output, shape index: {0}]   ;;  %s4409_s16 = inlined_call_operand.vmem [shape: f32[2,256], index: 16, kind: output, shape index: {1}]  }
   0x1   :  { %4412 = sst [smem:[#allocation16_spill]] %s4393_s0 }
   0x2   :  { %22 = vsyncpa [#allocation3], 0 }
   0x3   :  { %23 = vsyncpa [#allocation6], 0 }
   0x4   :  { %24 = vsyncpa [#allocation9], 0 }
   0x5   :  { %25 = vsyncpa [#allocation4], 0  ;;  %s3708_s21 = smov [#allocation5]   ;;  %s3568_s25 = scalar_lea.hbm %s4402_s9, 2048 }
   0x6   :  { %s59_s22 = sshll.u32 %s3708_s21, 4  ;;  %p3569_p0 = scmp.ne.s32.totalorder %s4402_s9, %s3568_s25  ;;  %s60_s22 = int_to_ptr.vmem [resolvable:$true] %s59_s22 }
   0x7   :  { %p3572_p1 = scmp.lt.u32.totalorder %s3568_s25, %s4402_s9 }
   0x9   :  { %p3574_p2 = pnand %p3572_p1, %p3569_p0 }
   0xb   :  { %3577 = shalt.err (!%p3574_p2)
}
   0xc   :  { %s3578_s30 = scalar_lea.vmem %s60_s22, 2048  ;;  %p3583_p4 = scmp.lt.s32.totalorder %s60_s22, %s60_s22 }
   0xd   :  { %p3579_p3 = scmp.ne.s32.totalorder %s60_s22, %s3578_s30  ;;  %p3584_p5 = scmp.lt.s32.totalorder %s3578_s30, %s3578_s30 }
   0xf   :  { %p3585_p6 = por %p3584_p5, %p3583_p4 }
  0x11   :  { %p3586_p7 = pnand %p3585_p6, %p3579_p3 }
  0x13   :  { %3589 = shalt.err (!%p3586_p7)
}
  0x14   :  { %s4410_s0 = smov 128   ;;  %s3710_s17 = smov 8  }
  0x15   :  { %65 = dma.hbm_to_vmem [thread:$0]  %s4402_s9, 2048, %s60_s22, [#allocation6], %s4410_s0, %s4410_s0, %s3710_s17  }
  0x16   :  { %s3711_s20 = smov [#allocation8]   ;;  %s3590_s25 = scalar_lea.hbm %s4404_s11, 4096 }
  0x17   :  { %s83_s21 = sshll.u32 %s3711_s20, 4  ;;  %p3591_p8 = scmp.ne.s32.totalorder %s4404_s11, %s3590_s25  ;;  %s84_s21 = int_to_ptr.vmem [resolvable:$true] %s83_s21 }
  0x18   :  { %p3594_p9 = scmp.lt.u32.totalorder %s3590_s25, %s4404_s11 }
  0x1a   :  { %p3596_p10 = pnand %p3594_p9, %p3591_p8 }
  0x1c   :  { %3599 = shalt.err (!%p3596_p10)
}
  0x1d   :  { %s3600_s30 = scalar_lea.vmem %s84_s21, 4096  ;;  %p3605_p12 = scmp.lt.s32.totalorder %s84_s21, %s84_s21 }
  0x1e   :  { %p3601_p11 = scmp.ne.s32.totalorder %s84_s21, %s3600_s30  ;;  %p3606_p13 = scmp.lt.s32.totalorder %s3600_s30, %s3600_s30 }
  0x20   :  { %p3607_p0 = por %p3606_p13, %p3605_p12 }
  0x22   :  { %p3608_p1 = pnand %p3607_p0, %p3601_p11 }
  0x24   :  { %3611 = shalt.err (!%p3608_p1)
}
  0x25   :  { %s3712_s9 = smov 256   ;;  %s3713_s22 = smov 16  }
  0x26   :  { %89 = dma.hbm_to_vmem [thread:$0]  %s4404_s11, 4096, %s84_s21, [#allocation9], %s3712_s9, %s3712_s9, %s3713_s22  }
  0x27   :  { %s3714_s20 = smov [#allocation2]   ;;  %s3612_s26 = scalar_lea.hbm %s4397_s4, 2048 }
  0x28   :  { %s39_s23 = sshll.u32 %s3714_s20, 4  ;;  %p3613_p2 = scmp.ne.s32.totalorder %s4397_s4, %s3612_s26  ;;  %s40_s23 = int_to_ptr.vmem [resolvable:$true] %s39_s23 }
  0x29   :  { %p3616_p3 = scmp.lt.u32.totalorder %s3612_s26, %s4397_s4 }
  0x2b   :  { %p3618_p4 = pnand %p3616_p3, %p3613_p2 }
  0x2d   :  { %3621 = shalt.err (!%p3618_p4)
}
  0x2e   :  { %s3622_s0 = scalar_lea.vmem %s40_s23, 2048  ;;  %p3627_p6 = scmp.lt.s32.totalorder %s40_s23, %s40_s23 }
  0x2f   :  { %p3623_p5 = scmp.ne.s32.totalorder %s40_s23, %s3622_s0  ;;  %p3628_p7 = scmp.lt.s32.totalorder %s3622_s0, %s3622_s0 }
  0x31   :  { %p3629_p8 = por %p3628_p7, %p3627_p6 }
  0x33   :  { %p3630_p9 = pnand %p3629_p8, %p3623_p5 }
  0x35   :  { %3633 = shalt.err (!%p3630_p9)
}
  0x36   :  { %s3715_s11 = smov 64   ;;  %s3716_s21 = smov 4  }
  0x37   :  { %45 = dma.hbm_to_vmem [thread:$0]  %s4397_s4, 2048, %s40_s23, [#allocation3], %s3715_s11, %s3715_s11, %s3716_s21  }
  0x38   :  { %s3717_s18 = smov [#allocation7]   ;;  %s3718_s20 = smov [#allocation10]  }
  0x39   :  { %s71_s19 = sshll.u32 %s3717_s18, 4  ;;  %s97_s24 = sshll.u32 %s3718_s20, 4  ;;  %s72_s19 = int_to_ptr.vmem [resolvable:$true] %s71_s19  ;;  %s98_s24 = int_to_ptr.vmem [resolvable:$true] %s97_s24 }
  0x3a   :  { %s3634_s27 = scalar_lea.hbm %s4403_s10, 2048 }
  0x3b   :  { %p3635_p10 = scmp.ne.s32.totalorder %s4403_s10, %s3634_s27  ;;  %p3638_p11 = scmp.lt.u32.totalorder %s3634_s27, %s4403_s10 }
  0x3d   :  { %p3640_p12 = pnand %p3638_p11, %p3635_p10 }
  0x3f   :  { %3643 = shalt.err (!%p3640_p12)
}
  0x40   :  { %s3644_s4 = scalar_lea.vmem %s72_s19, 2048  ;;  %p3649_p0 = scmp.lt.s32.totalorder %s72_s19, %s72_s19 }
  0x41   :  { %p3645_p13 = scmp.ne.s32.totalorder %s72_s19, %s3644_s4  ;;  %p3650_p1 = scmp.lt.s32.totalorder %s3644_s4, %s3644_s4 }
  0x43   :  { %p3651_p2 = por %p3650_p1, %p3649_p0 }
  0x45   :  { %p3652_p3 = pnand %p3651_p2, %p3645_p13 }
  0x47   :  { %3655 = shalt.err (!%p3652_p3)
}
  0x48   :  { %s4413_s23 = smov 128   ;;  %s3656_s18 = scalar_lea.hbm %s4406_s13, 8192 }
  0x49   :  { %77 = dma.hbm_to_vmem [thread:$0]  %s4403_s10, 2048, %s72_s19, [#allocation6], %s4413_s23, %s4413_s23, %s3710_s17  }
  0x4a   :  { %p3657_p4 = scmp.ne.s32.totalorder %s4406_s13, %s3656_s18  ;;  %p3660_p5 = scmp.lt.u32.totalorder %s3656_s18, %s4406_s13 }
  0x4c   :  { %p3662_p6 = pnand %p3660_p5, %p3657_p4 }
  0x4e   :  { %3665 = shalt.err (!%p3662_p6)
}
  0x4f   :  { %s3666_s28 = scalar_lea.vmem %s98_s24, 8192  ;;  %p3671_p8 = scmp.lt.s32.totalorder %s98_s24, %s98_s24 }
  0x50   :  { %p3667_p7 = scmp.ne.s32.totalorder %s98_s24, %s3666_s28  ;;  %p3672_p9 = scmp.lt.s32.totalorder %s3666_s28, %s3666_s28 }
  0x52   :  { %p3673_p10 = por %p3672_p9, %p3671_p8 }
  0x54   :  { %p3674_p11 = pnand %p3673_p10, %p3667_p7 }
  0x56   :  { %3677 = shalt.err (!%p3674_p11)
}
  0x57   :  { %103 = dma.hbm_to_vmem [thread:$0]  %s4406_s13, 8192, %s98_s24, [#allocation9], %s4413_s23, %s4413_s23, %s3710_s17  }
  0x58   :  { %3700 = dma.done.wait [#allocation3], 2048  }
  0x59   :  { %3701 = vsyncadd [#allocation3], 4294965248 }
  0x5a   :  { %3702 = dma.done.wait [#allocation6], 4096  }
  0x5b   :  { %3703 = vsyncadd [#allocation6], 4294963200 }
  0x5c   :  { %3704 = dma.done.wait [#allocation9], 12288  }
  0x5d   :  { %3705 = vsyncadd [#allocation9], 4294955008  ;;  %v3719_v0 = vmov 0.0   ;;  %vm3720_vm0 = vmmov 0   ;;  %v3721_v1 = vmov 0   ;;  %v3300_v2 = vld [vmem:[#allocation2] sm:$0xff]  }
  0x5e   :  { %2830 = vmatprep.subr.bf16.mxu0 %v3719_v0  ;;  %2846 = vmatprep.mubr.msk.bf16.mxu0 %vm3720_vm0, %v3719_v0  ;;  %v3301_v3 = vld [vmem:[%s4398_s5 + $0x4] ss:$8 sps:$4 sm:$0xff]   ;;  %v3303_v4 = vld [vmem:[%s4398_s5] ss:$8 sps:$4 sm:$0xff]   ;;  %v3305_v6 = vld [vmem:[%s4398_s5 + $0x14] ss:$8 sps:$4 sm:$0xff]  }
  0x5f   :  { %443 = vmatprep.mubr.bf16.mxu1 %v3721_v1  ;;  %2831 = vmatpush3.bf16.msra.mxu0 %v3300_v2  ;;  %v3304_v5 = vld [vmem:[#allocation2 + $0x8] sm:$0xff]   ;;  %v3307_v7 = vld [vmem:[%s4398_s5 + $0x10] ss:$8 sps:$4 sm:$0xff]   ;;  %v3313_v11 = vld [vmem:[%s4398_s5 + $0x34] ss:$8 sps:$4 sm:$0xff]   ;;  %s4414_s27 = sld [smem:[#allocation16_spill]] }
  0x60   :  { %411 = vmatprep.subr.bf16.mxu1 %v3301_v3  ;;  %2832 = vmatprep.subr.bf16.mxu0 %v3719_v0  ;;  %v3308_v8 = vld [vmem:[#allocation2 + $0x10] sm:$0xff]   ;;  %v3309_v9 = vld [vmem:[%s4398_s5 + $0x24] ss:$8 sps:$4 sm:$0xff]   ;;  %v3311_v10 = vld [vmem:[%s4398_s5 + $0x20] ss:$8 sps:$4 sm:$0xff]   ;;  %vm945_vm1 = vcmask 261120  }
  0x61   :  { %412 = vmatpush1.bf16.msra.mxu1 %v3303_v4  ;;  %v3312_v12 = vld [vmem:[#allocation2 + $0x18] sm:$0xff]   ;;  %v3317_v14 = vld [vmem:[%s4398_s5 + $0x44] ss:$8 sps:$4 sm:$0xff]   ;;  %v3319_v16 = vld [vmem:[%s4398_s5 + $0x40] ss:$8 sps:$4 sm:$0xff]   ;;  %vm1494_vm2 = vcmask 1041409  }
  0x62   :  { %413 = vmatprep.subr.bf16.mxu1 %v3305_v6  ;;  %v3315_v13 = vld [vmem:[%s4398_s5 + $0x30] ss:$8 sps:$4 sm:$0xff]   ;;  %v3316_v15 = vld [vmem:[#allocation2 + $0x20] sm:$0xff]   ;;  %v3321_v17 = vld [vmem:[%s4398_s5 + $0x54] ss:$8 sps:$4 sm:$0xff]   ;;  %vm1888_vm3 = vcmask 1041408  }
  0x63   :  { %2833 = vmatpush3.bf16.msra.mxu0 %v3304_v5  ;;  %v3320_v18 = vld [vmem:[#allocation2 + $0x28] sm:$0xff]   ;;  %v3323_v19 = vld [vmem:[%s4398_s5 + $0x50] ss:$8 sps:$4 sm:$0xff]   ;;  %v3329_v23 = vld [vmem:[%s4398_s5 + $0x74] ss:$8 sps:$4 sm:$0xff]  }
  0x64   :  { %2834 = vmatprep.subr.bf16.mxu0 %v3719_v0  ;;  %v3325_v20 = vld [vmem:[%s4398_s5 + $0x64] ss:$8 sps:$4 sm:$0xff]   ;;  %v3324_v21 = vld [vmem:[#allocation2 + $0x30] sm:$0xff]   ;;  %v3327_v22 = vld [vmem:[%s4398_s5 + $0x60] ss:$8 sps:$4 sm:$0xff]  }
  0x65   :  { %414 = vmatpush1.bf16.msra.mxu1 %v3307_v7  ;;  %v3328_v24 = vld [vmem:[#allocation2 + $0x38] sm:$0xff]   ;;  %v3335_v26 = vld [vmem:[%s4398_s5 + $0x84] ss:$8 sps:$4 sm:$0xff]   ;;  %v122_v27 = vld [vmem:[%s4414_s27] sm:$0x1] }
  0x66   :  { %415 = vmatprep.subr.bf16.mxu1 %v3309_v9  ;;  %v3331_v25 = vld [vmem:[%s4398_s5 + $0x70] ss:$8 sps:$4 sm:$0xff]   ;;  %v3332_v28 = vld [vmem:[%s4394_s1] sm:$0xff]   ;;  %v3338_v30 = vld [vmem:[%s4398_s5 + $0x94] ss:$8 sps:$4 sm:$0xff]  }
  0x67   :  { %2835 = vmatpush3.bf16.msra.mxu0 %v3308_v8  ;;  %v3333_v29 = vld [vmem:[%s4398_s5 + $0x80] ss:$8 sps:$4 sm:$0xff]   ;;  %v257_v33 = vld [vmem:[#allocation5 + $0x10] sm:$0xff]  ;;  %v258_v34 = vld [vmem:[#allocation5 + $0x18] sm:$0xff]  ;;  %v236_v8 = vlaneseq  ;;  %v3722_v9 = vmov 1966171168  }
  0x68   :  { %2836 = vmatprep.subr.bf16.mxu0 %v3719_v0  ;;  %v255_v31 = vld [vmem:[#allocation5] sm:$0xff]  ;;  %v256_v32 = vld [vmem:[#allocation5 + $0x8] sm:$0xff]  ;;  %v3336_v36 = vld [vmem:[%s4398_s5 + $0x90] ss:$8 sps:$4 sm:$0xff]   ;;  %v3957_v37 = vpack.c.bf16 %v258_v34, %v257_v33 }
  0x69   :  { %416 = vmatpush1.bf16.msra.mxu1 %v3311_v10  ;;  %v3952_v35 = vpack.c.bf16 %v256_v32, %v255_v31  ;;  %v3342_v38 = vld [vmem:[%s4398_s5 + $0xa4] ss:$8 sps:$4 sm:$0xff]   ;;  %v3340_v42 = vld [vmem:[%s4398_s5 + $0xa0] ss:$8 sps:$4 sm:$0xff]   ;;  %v261_v43 = vld [vmem:[#allocation5 + $0x30] sm:$0xff]  ;;  %v234_v10 = vunpack.c.l.s4 %v3722_v9 }
  0x6a   :  { %417 = vmatprep.subr.bf16.mxu1 %v3313_v11  ;;  %v259_v39 = vld [vmem:[#allocation5 + $0x20] sm:$0xff]  ;;  %v260_v40 = vld [vmem:[#allocation5 + $0x28] sm:$0xff]  ;;  %v262_v44 = vld [vmem:[#allocation5 + $0x38] sm:$0xff]  ;;  %v4032_v11 = vshrl.u32 %v236_v8, 7 }
  0x6b   :  { %2837 = vmatpush3.bf16.msra.mxu0 %v3312_v12  ;;  %v3339_v41 = vld [vmem:[%s4394_s1 + $0x8] sm:$0xff]   ;;  %v3345_v45 = vld [vmem:[%s4398_s5 + $0xb4] ss:$8 sps:$4 sm:$0xff]   ;;  %v3975_v46 = vpack.c.bf16 %v260_v40, %v259_v39  ;;  %v3343_v47 = vld [vmem:[%s4398_s5 + $0xb0] ss:$8 sps:$4 sm:$0xff]   ;;  %v3985_v51 = vpack.c.bf16 %v262_v44, %v261_v43  ;;  %v235_v12 = vunpack.c.0.s8 %v234_v10 }
  0x6c   :  { %2838 = vmatprep.subr.bf16.mxu0 %v3719_v0  ;;  %v263_v48 = vld [vmem:[#allocation5 + $0x40] sm:$0xff]  ;;  %v264_v49 = vld [vmem:[#allocation5 + $0x48] sm:$0xff]  ;;  %v265_v53 = vld [vmem:[#allocation5 + $0x50] sm:$0xff] }
  0x6d   :  { %418 = vmatpush1.bf16.msra.mxu1 %v3315_v13  ;;  %v3348_v50 = vld [vmem:[%s4398_s5 + $0xc4] ss:$8 sps:$4 sm:$0xff]   ;;  %v3346_v52 = vld [vmem:[%s4398_s5 + $0xc0] ss:$8 sps:$4 sm:$0xff]   ;;  %v266_v54 = vld [vmem:[#allocation5 + $0x58] sm:$0xff]  ;;  %v3996_v56 = vpack.c.bf16 %v264_v49, %v263_v48  ;;  %v4035_v13 = vsub.s32 1, %v4032_v11 }
  0x6e   :  { %419 = vmatprep.subr.bf16.mxu1 %v3317_v14  ;;  %v3351_v55 = vld [vmem:[%s4398_s5 + $0xd4] ss:$8 sps:$4 sm:$0xff]   ;;  %v3349_v57 = vld [vmem:[%s4398_s5 + $0xd0] ss:$8 sps:$4 sm:$0xff]   ;;  %v3354_v58 = vld [vmem:[%s4398_s5 + $0xe4] ss:$8 sps:$4 sm:$0xff]   ;;  %v4006_v59 = vpack.c.bf16 %v266_v54, %v265_v53 }
  0x6f   :  { %2839 = vmatpush3.bf16.msra.mxu0 %v3316_v15  ;;  %v3352_v60 = vld [vmem:[%s4398_s5 + $0xe0] ss:$8 sps:$4 sm:$0xff]   ;;  %v3357_v61 = vld [vmem:[%s4398_s5 + $0xf4] ss:$8 sps:$4 sm:$0xff]   ;;  %v3355_v62 = vld [vmem:[%s4398_s5 + $0xf0] ss:$8 sps:$4 sm:$0xff]  }
  0x70   :  { %2840 = vmatprep.subr.bf16.mxu0 %v3719_v0  ;;  %v3358_v63 = vld [vmem:[%s4395_s2] sm:$0xff]   ;;  %v268_v3 = vld [vmem:[#allocation5 + $0x68] sm:$0xff]  ;;  %v269_v5 = vld [vmem:[#allocation5 + $0x70] sm:$0xff]  ;;  %v4038_v14 = vsub.s32 0, %v4032_v11 }
  0x71   :  { %420 = vmatpush1.bf16.msra.mxu1 %v3319_v16  ;;  %v267_v2 = vld [vmem:[#allocation5 + $0x60] sm:$0xff]  ;;  %v270_v6 = vld [vmem:[#allocation5 + $0x78] sm:$0xff] }
  0x72   :  { %421 = vmatprep.subr.bf16.mxu1 %v3321_v17  ;;  %v4023_v4 = vpack.c.bf16 %v268_v3, %v267_v2  ;;  %v4027_v7 = vpack.c.bf16 %v270_v6, %v269_v5  ;;  %v303_v15 = vld [vmem:[%s4400_s7] ss:$4 sm:$0x3]  ;;  %v238_v17 = vsub.s32 %v235_v12, %v4032_v11 }
  0x73   :  { %2841 = vmatpush3.bf16.msra.mxu0 %v3320_v18  ;;  %v2505_v16 = vld [vmem:[%s4401_s8] ss:$0 sm:$0xff]  ;;  %v3361_v9 = vld [vmem:[%s4399_s6 + $0x4] ss:$8 sps:$4 sm:$0xff]  }
  0x74   :  { %2842 = vmatprep.subr.bf16.mxu0 %v3719_v0  ;;  %v3359_v10 = vld [vmem:[%s4399_s6] ss:$8 sps:$4 sm:$0xff]   ;;  %v3389_v12 = vld [vmem:[%s4396_s3 + $0x4] ss:$8 sps:$4 sm:$0xff]  }
  0x75   :  { %422 = vmatpush1.bf16.msra.mxu1 %v3323_v19  ;;  %v316_v19 = vrot.slane %v303_v15, %v4035_v13 }
  0x76   :  { %423 = vmatprep.subr.bf16.mxu1 %v3325_v20 }
  0x77   :  { %2843 = vmatpush3.bf16.msra.mxu0 %v3324_v21 }
  0x78   :  { %2844 = vmatprep.subr.bf16.mxu0 %v3719_v0 }
  0x79   :  { %424 = vmatpush1.bf16.msra.mxu1 %v3327_v22  ;;  %v312_v22 = vrot.slane %v303_v15, %v4038_v14 }
  0x7a   :  { %425 = vmatprep.subr.bf16.mxu1 %v3329_v23 }
  0x7b   :  { %2845 = vmatpush3.bf16.msra.mxu0 %v3328_v24 }
  0x7c   :  { %3087 = vmatprep.subr.bf16.mxu0 %v3952_v35 }
  0x7d   :  { %426 = vmatpush1.bf16.msra.mxu1 %v3331_v25 }
  0x7e   :  { %2847 = vmatmul.mubr.bf16.vlgmr.msra.gmra.mrb[0].mxu0 %v122_v27  ;;  %681 = vmatprep.subr.bf16.mxu1 %v3335_v26 }
  0x7f   :  { %3089 = vmatpush3.bf16.msra.mxu0 %v3952_v35 }
  0x80   :  { %444 = vmatmul.mubr.bf16.vlgmr.msra.gmra.mrb[0].mxu1 %v3332_v28  ;;  %3091 = vmatprep.subr.bf16.mxu0 %v3957_v37 }
  0x81   :  { %682 = vmatpush1.bf16.msra.mxu1 %v3333_v29  ;;  %453 = vmatprep.mubr.bf16.mxu1 %v3721_v1 }
  0x82   :  { %683 = vmatprep.subr.bf16.mxu1 %v3338_v30 }
  0x83   :  { %3093 = vmatpush3.bf16.msra.mxu0 %v3957_v37 }
  0x84   :  { %3095 = vmatprep.subr.bf16.mxu0 %v3975_v46 }
  0x85   :  { %684 = vmatpush1.bf16.msra.mxu1 %v3336_v36 }
  0x86   :  { %685 = vmatprep.subr.bf16.mxu1 %v3342_v38 }
  0x87   :  { %3097 = vmatpush3.bf16.msra.mxu0 %v3975_v46 }
  0x88   :  { %454 = vmatmul.mubr.bf16.gmra.mrb[4].mxu1 %v3339_v41  ;;  %3099 = vmatprep.subr.bf16.mxu0 %v3985_v51 }
  0x89   :  { %686 = vmatpush1.bf16.msra.mxu1 %v3340_v42  ;;  %713 = vmatprep.mubr.bf16.mxu1 %v3721_v1 }
  0x8a   :  { %687 = vmatprep.subr.bf16.mxu1 %v3345_v45 }
  0x8b   :  { %3101 = vmatpush3.bf16.msra.mxu0 %v3985_v51 }
  0x8c   :  { %3103 = vmatprep.subr.bf16.mxu0 %v3996_v56 }
  0x8d   :  { %688 = vmatpush1.bf16.msra.mxu1 %v3343_v47 }
  0x8e   :  { %689 = vmatprep.subr.bf16.mxu1 %v3348_v50 }
  0x8f   :  { %3105 = vmatpush3.bf16.msra.mxu0 %v3996_v56 }
  0x90   :  { %3107 = vmatprep.subr.bf16.mxu0 %v4006_v59 }
  0x91   :  { %690 = vmatpush1.bf16.msra.mxu1 %v3346_v52 }
  0x92   :  { %691 = vmatprep.subr.bf16.mxu1 %v3351_v55  ;;  %v2548_v55 = vld [vmem:[%s4400_s7 + $0x1] ss:$4 sm:$0x3] }
  0x93   :  { %3109 = vmatpush3.bf16.msra.mxu0 %v4006_v59 }
  0x94   :  { %3111 = vmatprep.subr.bf16.mxu0 %v4023_v4 }
  0x95   :  { %692 = vmatpush1.bf16.msra.mxu1 %v3349_v57  ;;  %v588_v57 = vrot.slane %v2548_v55, %v4038_v14 }
  0x96   :  { %693 = vmatprep.subr.bf16.mxu1 %v3354_v58  ;;  %v592_v58 = vrot.slane %v2548_v55, %v4035_v13 }
  0x97   :  { %3113 = vmatpush3.bf16.msra.mxu0 %v4023_v4 }
  0x98   :  { %3115 = vmatprep.subr.bf16.mxu0 %v4027_v7 }
  0x99   :  { %694 = vmatpush1.bf16.msra.mxu1 %v3352_v60 }
  0x9a   :  { %695 = vmatprep.subr.bf16.mxu1 %v3357_v61 }
  0x9b   :  { %3117 = vmatpush3.bf16.msra.mxu0 %v4027_v7 }
  0x9c   :  { %3119 = vmatprep.subr.bf16.mxu0 %v3952_v35 }
  0x9d   :  { %696 = vmatpush1.bf16.msra.mxu1 %v3355_v62 }
  0xa0   :  { %714 = vmatmul.mubr.bf16.vlgmr.msra.gmra.mrb[8].mxu1 %v3358_v63 }
 0x151   :  { %v226_v18 = vpop.f32.mrb[0].mxu0 }
 0x152   :  { %v227_v20 = vadd.f32 %v2505_v16, %v226_v18  ;;  %v2848_v21 = vpop.f32.mrb[1].mxu0  ;;  %v3364_v16 = vld [vmem:[%s4399_s6 + $0x14] ss:$8 sps:$4 sm:$0xff]   ;;  %v3367_v18 = vld [vmem:[%s4399_s6 + $0x24] ss:$8 sps:$4 sm:$0xff]  }
 0x153   :  { %v229_v23 = vpop.f32.mrb[2].mxu0  ;;  %v445_v24 = vpop.f32.mrb[0].mxu1  ;;  %v3368_v21 = vld [vmem:[%s4399_s6 + $0x30] ss:$8 sps:$4 sm:$0xff]  }
 0x154   :  { %v239_v25 = vrot.slane %v227_v20, %v238_v17  ;;  %v2849_v26 = vpop.f32.mrb[3].mxu0  ;;  %v447_v27 = vpop.f32.mrb[1].mxu1  ;;  %v446_v32 = vadd.f32 %v445_v24, %v312_v22  ;;  %v3370_v20 = vld [vmem:[%s4399_s6 + $0x34] ss:$8 sps:$4 sm:$0xff]   ;;  %v3371_v23 = vld [vmem:[%s4399_s6 + $0x40] ss:$8 sps:$4 sm:$0xff]  }
 0x155   :  { %v4049_v28 = vadd.f32 %v447_v27, %v316_v19  ;;  %v449_v29 = vpop.f32.mrb[2].mxu1  ;;  %v3376_v24 = vld [vmem:[%s4399_s6 + $0x54] ss:$8 sps:$4 sm:$0xff]   ;;  %v3379_v26 = vld [vmem:[%s4399_s6 + $0x64] ss:$8 sps:$4 sm:$0xff]  }
 0x156   :  { %v240_v30 = vcombine.high %v239_v25, %v239_v25  ;;  %v247_v31 = vrot.slane %v239_v25, %v238_v17  ;;  %v450_v33 = vadd.f32 %v449_v29, %v312_v22  ;;  %v451_v34 = vpop.f32.mrb[3].mxu1  ;;  %v3374_v25 = vld [vmem:[%s4399_s6 + $0x50] ss:$8 sps:$4 sm:$0xff]   ;;  %v3377_v27 = vld [vmem:[%s4399_s6 + $0x60] ss:$8 sps:$4 sm:$0xff]  }
 0x157   :  { %v4051_v36 = vadd.f32 %v451_v34, %v316_v19  ;;  %v3382_v29 = vld [vmem:[%s4399_s6 + $0x74] ss:$8 sps:$4 sm:$0xff]   ;;  %v3386_v34 = vld [vmem:[%s4399_s6 + $0x90] ss:$8 sps:$4 sm:$0xff]  }
 0x158   :  { %v254_v38 = vrot.slane %v240_v30, %v238_v17  ;;  %v4054_v39 = vrot.slane %v247_v31, %v4038_v14  ;;  %v3362_v17 = vld [vmem:[%s4399_s6 + $0x10] ss:$8 sps:$4 sm:$0xff]   ;;  %v3385_v31 = vld [vmem:[%s4399_s6 + $0x84] ss:$8 sps:$4 sm:$0xff]  }
 0x159   :  { %v3380_v30 = vld [vmem:[%s4399_s6 + $0x70] ss:$8 sps:$4 sm:$0xff]  }
 0x15a   :  { %v4057_v40 = vrot.slane %v254_v38, %v4038_v14  ;;  %v474_v41 = vmul.f32 %v4054_v39, %v446_v32  ;;  %v475_v42 = vmul.f32 %v4054_v39, %v450_v33  ;;  %v3383_v32 = vld [vmem:[%s4399_s6 + $0x80] ss:$8 sps:$4 sm:$0xff]   ;;  %v3388_v33 = vld [vmem:[%s4399_s6 + $0x94] ss:$8 sps:$4 sm:$0xff]  }
 0x15b   :  { %v455_v43 = vpop.f32.mrb[4].mxu1  ;;  %v3391_v38 = vld [vmem:[%s4396_s3] ss:$8 sps:$4 sm:$0xff]  }
 0x15c   :  { %v456_v44 = vadd.f32 %v455_v43, %v312_v22  ;;  %v457_v45 = vpop.f32.mrb[5].mxu1  ;;  %2882 = vmatprep.mubr.f32.mxu0 %v474_v41 }
 0x15d   :  { %v4061_v47 = vadd.f32 %v457_v45, %v316_v19  ;;  %v459_v48 = vpop.f32.mrb[6].mxu1  ;;  %2883 = vmatmul.mubr.f32.vlgmr.msra.gmra.mrb[4].mxu0 %v475_v42 }
 0x15e   :  { %v476_v49 = vmul.f32 %v4057_v40, %v456_v44  ;;  %v460_v50 = vadd.f32 %v459_v48, %v312_v22  ;;  %3121 = vmatpush3.bf16.msra.mxu0 %v3952_v35  ;;  %v461_v52 = vpop.f32.mrb[7].mxu1  ;;  %v3373_v22 = vld [vmem:[%s4399_s6 + $0x44] ss:$8 sps:$4 sm:$0xff]  }
 0x15f   :  { %3123 = vmatprep.subr.bf16.mxu0 %v3957_v37  ;;  %v4066_v53 = vadd.f32 %v461_v52, %v316_v19  ;;  %v3365_v19 = vld [vmem:[%s4399_s6 + $0x20] ss:$8 sps:$4 sm:$0xff]  }
 0x160   :  { %v477_v54 = vmul.f32 %v4057_v40, %v460_v50  ;;  %2885 = vmatprep.mubr.f32.mxu0 %v476_v49 }
 0x162   :  { %2886 = vmatmul.mubr.f32.gmra.mrb[6].mxu0 %v477_v54 }
 0x163   :  { %3125 = vmatpush3.bf16.msra.mxu0 %v3957_v37 }
 0x164   :  { %3127 = vmatprep.subr.bf16.mxu0 %v3975_v46 }
 0x167   :  { %3129 = vmatpush3.bf16.msra.mxu0 %v3975_v46 }
 0x168   :  { %3131 = vmatprep.subr.bf16.mxu0 %v3985_v51 }
 0x16b   :  { %3133 = vmatpush3.bf16.msra.mxu0 %v3985_v51 }
 0x16c   :  { %3135 = vmatprep.subr.bf16.mxu0 %v3996_v56 }
 0x16f   :  { %3137 = vmatpush3.bf16.msra.mxu0 %v3996_v56 }
 0x170   :  { %3139 = vmatprep.subr.bf16.mxu0 %v4006_v59 }
 0x173   :  { %3141 = vmatpush3.bf16.msra.mxu0 %v4006_v59  ;;  %v715_v60 = vpop.f32.mrb[8].mxu1 }
 0x174   :  { %v716_v61 = vadd.f32 %v715_v60, %v588_v57  ;;  %v717_v62 = vpop.f32.mrb[9].mxu1  ;;  %3143 = vmatprep.subr.bf16.mxu0 %v4023_v4 }
 0x175   :  { %v4084_v63 = vadd.f32 %v717_v62, %v592_v58  ;;  %v719_v2 = vpop.f32.mrb[10].mxu1 }
 0x176   :  { %v724_v3 = vmul.f32 %v716_v61, %v4054_v39  ;;  %v721_v5 = vpop.f32.mrb[11].mxu1  ;;  %v720_v8 = vadd.f32 %v719_v2, %v588_v57 }
 0x177   :  { %3145 = vmatpush3.bf16.msra.mxu0 %v4023_v4  ;;  %v4088_v6 = vadd.f32 %v721_v5, %v592_v58 }
 0x178   :  { %2920 = vmatprep.mubr.f32.mxu0 %v724_v3  ;;  %3147 = vmatprep.subr.bf16.mxu0 %v4027_v7  ;;  %v725_v15 = vmul.f32 %v720_v8, %v4057_v40 }
 0x17b   :  { %3149 = vmatpush3.bf16.msra.mxu0 %v4027_v7 }
 0x17c   :  { %949 = vmatprep.subr.bf16.mxu0 %v3361_v9 }
 0x17e   :  { %2921 = vmatmul.mubr.f32.vlgmr.msra.gmra.mrb[8].mxu0 %v725_v15 }
 0x17f   :  { %950 = vmatpush1.bf16.msra.mxu0 %v3359_v10  ;;  %2589 = vmatprep.mubr.msk.bf16.mxu0 %vm945_vm1, %v3389_v12 }
 0x180   :  { %951 = vmatprep.subr.bf16.mxu0 %v3364_v16 }
 0x183   :  { %952 = vmatpush1.bf16.msra.mxu0 %v3362_v17 }
 0x184   :  { %953 = vmatprep.subr.bf16.mxu0 %v3367_v18 }
 0x187   :  { %954 = vmatpush1.bf16.msra.mxu0 %v3365_v19 }
 0x188   :  { %955 = vmatprep.subr.bf16.mxu0 %v3370_v20 }
 0x18b   :  { %956 = vmatpush1.bf16.msra.mxu0 %v3368_v21  ;;  %v2566_v21 = vld [vmem:[%s4400_s7 + $0x2] ss:$4 sm:$0x3] }
 0x18c   :  { %957 = vmatprep.subr.bf16.mxu0 %v3373_v22  ;;  %v829_v22 = vrot.slane %v2566_v21, %v4038_v14 }
 0x18f   :  { %958 = vmatpush1.bf16.msra.mxu0 %v3371_v23  ;;  %v833_v23 = vrot.slane %v2566_v21, %v4035_v13 }
 0x190   :  { %959 = vmatprep.subr.bf16.mxu0 %v3376_v24 }
 0x193   :  { %960 = vmatpush1.bf16.msra.mxu0 %v3374_v25 }
 0x194   :  { %961 = vmatprep.subr.bf16.mxu0 %v3379_v26 }
 0x197   :  { %962 = vmatpush1.bf16.msra.mxu0 %v3377_v27 }
 0x198   :  { %963 = vmatprep.subr.bf16.mxu0 %v3382_v29 }
 0x19b   :  { %964 = vmatpush1.bf16.msra.mxu0 %v3380_v30 }
 0x19c   :  { %965 = vmatprep.subr.bf16.mxu0 %v3385_v31 }
 0x19f   :  { %966 = vmatpush1.bf16.msra.mxu0 %v3383_v32 }
 0x1a0   :  { %967 = vmatprep.subr.bf16.mxu0 %v3388_v33 }
 0x1a3   :  { %968 = vmatpush1.bf16.msra.mxu0 %v3386_v34 }
 0x1a4   :  { %3151 = vmatprep.subr.bf16.mxu0 %v3952_v35 }
 0x1a6   :  { %982 = vmatmul.mubr.bf16.vlgmr.msra.gmra.mrb[12].mxu0 %v3391_v38  ;;  %v273_v38 = vld [vmem:[#allocation7 + $0x10] sm:$0xff] }
 0x1a7   :  { %3153 = vmatpush3.bf16.msra.mxu0 %v3952_v35  ;;  %v271_v35 = vld [vmem:[#allocation7] sm:$0xff] }
 0x1a8   :  { %3155 = vmatprep.subr.bf16.mxu0 %v3957_v37 }
 0x1ab   :  { %3157 = vmatpush3.bf16.msra.mxu0 %v3957_v37  ;;  %v272_v37 = vld [vmem:[#allocation7 + $0x8] sm:$0xff] }
 0x1ac   :  { %3159 = vmatprep.subr.bf16.mxu0 %v3975_v46 }
 0x1af   :  { %3161 = vmatpush3.bf16.msra.mxu0 %v3975_v46  ;;  %v4175_v46 = vpack.c.bf16 %v272_v37, %v271_v35  ;;  %v274_v35 = vld [vmem:[#allocation7 + $0x18] sm:$0xff] }
 0x1b0   :  { %3163 = vmatprep.subr.bf16.mxu0 %v3985_v51  ;;  %v4224_v37 = vpack.c.bf16 %v274_v35, %v273_v38 }
 0x1b1   :  { %3183 = vmatprep.subr.bf16.mxu1 %v4175_v46 }
 0x1b2   :  { %3185 = vmatpush3.bf16.msra.mxu1 %v4175_v46 }
 0x1b3   :  { %3165 = vmatpush3.bf16.msra.mxu0 %v3985_v51  ;;  %3187 = vmatprep.subr.bf16.mxu1 %v4224_v37 }
 0x1b4   :  { %3167 = vmatprep.subr.bf16.mxu0 %v3996_v56 }
 0x1b6   :  { %3189 = vmatpush3.bf16.msra.mxu1 %v4224_v37 }
 0x1b7   :  { %3169 = vmatpush3.bf16.msra.mxu0 %v3996_v56 }
 0x1b8   :  { %3171 = vmatprep.subr.bf16.mxu0 %v4006_v59 }
 0x1bb   :  { %3173 = vmatpush3.bf16.msra.mxu0 %v4006_v59 }
 0x1bc   :  { %3175 = vmatprep.subr.bf16.mxu0 %v4023_v4 }
 0x1bf   :  { %3177 = vmatpush3.bf16.msra.mxu0 %v4023_v4 }
 0x1c0   :  { %3179 = vmatprep.subr.bf16.mxu0 %v4027_v7 }
 0x1c3   :  { %3181 = vmatpush3.bf16.msra.mxu0 %v4027_v7 }
 0x1c4   :  { %3215 = vmatprep.subr.bf16.mxu0 %v4175_v46 }
 0x230   :  { %v4180_v51 = vpop.f32.mrb[4].mxu0 }
 0x231   :  { %v4182_v56 = vpop.f32.mrb[5].mxu0 }
 0x232   :  { %v1069_v59 = vmax.f32 %v4182_v56, %v4180_v51 }
 0x234   :  { %v1070_v43 = vrot.slane %v1069_v59, 4 }
 0x235   :  { %v4186_v4 = vpop.f32.mrb[6].mxu0 }
 0x236   :  { %v4188_v7 = vpop.f32.mrb[7].mxu0  ;;  %v1071_v45 = vmax.f32 %v1069_v59, %v1070_v43  ;;  %v276_v59 = vld [vmem:[#allocation7 + $0x28] sm:$0xff] }
 0x237   :  { %v1076_v41 = vmax.f32 %v4188_v7, %v4186_v4 }
 0x238   :  { %v1072_v49 = vrot.slane %v1071_v45, 2 }
 0x239   :  { %v1077_v42 = vrot.slane %v1076_v41, 4 }
 0x23a   :  { %v1073_v60 = vmax.f32 %v1071_v45, %v1072_v49  ;;  %v280_v45 = vld [vmem:[#allocation7 + $0x48] sm:$0xff]  ;;  %v281_v49 = vld [vmem:[#allocation7 + $0x50] sm:$0xff] }
 0x23b   :  { %v1078_v44 = vmax.f32 %v1076_v41, %v1077_v42  ;;  %v278_v42 = vld [vmem:[#allocation7 + $0x38] sm:$0xff] }
 0x23c   :  { %v1074_v8 = vrot.slane %v1073_v60, 1 }
 0x23d   :  { %v1079_v48 = vrot.slane %v1078_v44, 2 }
 0x23e   :  { %v4204_v17 = vmax.f32 %v1073_v60, %v1074_v8  ;;  %v285_v60 = vld [vmem:[#allocation7 + $0x70] sm:$0xff] }
 0x23f   :  { %v1080_v57 = vmax.f32 %v1078_v44, %v1079_v48  ;;  %v279_v44 = vld [vmem:[#allocation7 + $0x40] sm:$0xff] }
 0x240   :  { %v4242_v48 = vpack.c.bf16 %v280_v45, %v279_v44 }
 0x241   :  { %v1081_v3 = vrot.slane %v1080_v57, 1 }
 0x243   :  { %v4200_v15 = vmax.f32 %v1080_v57, %v1081_v3  ;;  %v283_v57 = vld [vmem:[#allocation7 + $0x60] sm:$0xff] }
 0x251   :  { %v4192_v50 = vpop.f32.mrb[8].mxu0 }
 0x252   :  { %v1089_v52 = vrot.slane %v4192_v50, 4  ;;  %v4195_v54 = vpop.f32.mrb[9].mxu0 }
 0x253   :  { %v1083_v55 = vrot.slane %v4195_v54, 4 }
 0x254   :  { %v1090_v58 = vmax.f32 %v4192_v50, %v1089_v52  ;;  %v282_v52 = vld [vmem:[#allocation7 + $0x58] sm:$0xff] }
 0x255   :  { %v1084_v61 = vmax.f32 %v4195_v54, %v1083_v55  ;;  %v4248_v55 = vpack.c.bf16 %v282_v52, %v281_v49  ;;  %v3395_v52 = vld [vmem:[#allocation2 + $0x58] sm:$0xff]  }
 0x256   :  { %v1091_v62 = vrot.slane %v1090_v58, 2 }
 0x257   :  { %v1085_v2 = vrot.slane %v1084_v61, 2 }
 0x258   :  { %v1092_v5 = vmax.f32 %v1090_v58, %v1091_v62  ;;  %v284_v58 = vld [vmem:[#allocation7 + $0x68] sm:$0xff]  ;;  %v286_v62 = vld [vmem:[#allocation7 + $0x78] sm:$0xff] }
 0x259   :  { %v1086_v9 = vmax.f32 %v1084_v61, %v1085_v2  ;;  %v4254_v61 = vpack.c.bf16 %v284_v58, %v283_v57  ;;  %v4256_v2 = vpack.c.bf16 %v286_v62, %v285_v60  ;;  %v3397_v57 = vld [vmem:[#allocation2 + $0x68] sm:$0xff]   ;;  %v3398_v58 = vld [vmem:[#allocation2 + $0x70] sm:$0xff]   ;;  %v3399_v60 = vld [vmem:[#allocation2 + $0x78] sm:$0xff]  }
 0x25a   :  { %v1093_v10 = vrot.slane %v1092_v5, 1  ;;  %v3402_v62 = vld [vmem:[#allocation8 + $0x4] ss:$16 sps:$4 sm:$0xff]  }
 0x25b   :  { %v1087_v12 = vrot.slane %v1086_v9, 1 }
 0x25c   :  { %v4202_v16 = vmax.f32 %v1092_v5, %v1093_v10 }
 0x25d   :  { %v4206_v18 = vmax.f32 %v1086_v9, %v1087_v12 }
 0x25e   :  { %v1096_v19 = vmax.f32 %v4200_v15, %v4202_v16 }
 0x25f   :  { %v1095_v20 = vmax.f32 %v4204_v17, %v4206_v18 }
 0x279   :  { %v983_v24 = vpop.f32.mrb[12].mxu0 }
 0x27a   :  { %v984_v25 = vadd.f32 %v983_v24, %v829_v22  ;;  %v985_v26 = vpop.f32.mrb[13].mxu0 }
 0x27b   :  { %v4217_v27 = vadd.f32 %v985_v26, %v833_v23  ;;  %v987_v29 = vpop.f32.mrb[14].mxu0 }
 0x27c   :  { %v992_v30 = vmul.f32 %v984_v25, %v4054_v39  ;;  %v988_v31 = vadd.f32 %v987_v29, %v829_v22  ;;  %v989_v32 = vpop.f32.mrb[15].mxu0  ;;  %v275_v39 = vld [vmem:[#allocation7 + $0x20] sm:$0xff] }
 0x27d   :  { %v4220_v33 = vadd.f32 %v989_v32, %v833_v23  ;;  %v4230_v41 = vpack.c.bf16 %v276_v59, %v275_v39 }
 0x27e   :  { %v993_v34 = vmul.f32 %v988_v31, %v4057_v40  ;;  %2955 = vmatprep.mubr.f32.mxu0 %v992_v30  ;;  %v277_v40 = vld [vmem:[#allocation7 + $0x30] sm:$0xff] }
 0x27f   :  { %3191 = vmatprep.subr.bf16.mxu1 %v4230_v41  ;;  %v4236_v43 = vpack.c.bf16 %v278_v42, %v277_v40 }
 0x280   :  { %2956 = vmatmul.mubr.f32.vlgmr.msra.gmra.mrb[10].mxu0 %v993_v34  ;;  %3193 = vmatpush3.bf16.msra.mxu1 %v4230_v41 }
 0x281   :  { %3217 = vmatpush3.bf16.msra.mxu0 %v4175_v46  ;;  %3195 = vmatprep.subr.bf16.mxu1 %v4236_v43 }
 0x282   :  { %3219 = vmatprep.subr.bf16.mxu0 %v4224_v37 }
 0x284   :  { %3197 = vmatpush3.bf16.msra.mxu1 %v4236_v43 }
 0x285   :  { %3221 = vmatpush3.bf16.msra.mxu0 %v4224_v37  ;;  %3199 = vmatprep.subr.bf16.mxu1 %v4242_v48 }
 0x286   :  { %3223 = vmatprep.subr.bf16.mxu0 %v4230_v41 }
 0x288   :  { %3201 = vmatpush3.bf16.msra.mxu1 %v4242_v48 }
 0x289   :  { %3225 = vmatpush3.bf16.msra.mxu0 %v4230_v41  ;;  %3203 = vmatprep.subr.bf16.mxu1 %v4248_v55 }
 0x28a   :  { %3227 = vmatprep.subr.bf16.mxu0 %v4236_v43 }
 0x28c   :  { %3205 = vmatpush3.bf16.msra.mxu1 %v4248_v55 }
 0x28d   :  { %3229 = vmatpush3.bf16.msra.mxu0 %v4236_v43  ;;  %3207 = vmatprep.subr.bf16.mxu1 %v4254_v61 }
 0x28e   :  { %3231 = vmatprep.subr.bf16.mxu0 %v4242_v48 }
 0x290   :  { %3209 = vmatpush3.bf16.msra.mxu1 %v4254_v61 }
 0x291   :  { %3233 = vmatpush3.bf16.msra.mxu0 %v4242_v48  ;;  %3211 = vmatprep.subr.bf16.mxu1 %v4256_v2 }
 0x292   :  { %3235 = vmatprep.subr.bf16.mxu0 %v4248_v55 }
 0x294   :  { %3213 = vmatpush3.bf16.msra.mxu1 %v4256_v2 }
 0x295   :  { %3237 = vmatpush3.bf16.msra.mxu0 %v4248_v55  ;;  %3247 = vmatprep.subr.bf16.mxu1 %v4175_v46 }
 0x296   :  { %3239 = vmatprep.subr.bf16.mxu0 %v4254_v61 }
 0x299   :  { %3241 = vmatpush3.bf16.msra.mxu0 %v4254_v61 }
 0x29a   :  { %3243 = vmatprep.subr.bf16.mxu0 %v4256_v2 }
 0x29d   :  { %3245 = vmatpush3.bf16.msra.mxu0 %v4256_v2 }
 0x29e   :  { %3066 = vmatprep.subr.bf16.mxu0 %v3719_v0 }
 0x353   :  { %v2957_v3 = vpop.f32.mrb[10].mxu0 }
 0x354   :  { %v1103_v5 = vrot.slane %v2957_v3, 4  ;;  %v1060_v8 = vpop.f32.mrb[11].mxu0 }
 0x355   :  { %v1097_v9 = vrot.slane %v1060_v8, 4 }
 0x356   :  { %v1104_v10 = vmax.f32 %v2957_v3, %v1103_v5  ;;  %v3406_v5 = vld [vmem:[#allocation8 + $0x20] ss:$16 sps:$4 sm:$0xff]  }
 0x357   :  { %v1098_v12 = vmax.f32 %v1060_v8, %v1097_v9  ;;  %v3412_v9 = vld [vmem:[#allocation8 + $0x40] ss:$16 sps:$4 sm:$0xff]  }
 0x358   :  { %v1105_v21 = vrot.slane %v1104_v10, 2 }
 0x359   :  { %v1099_v22 = vrot.slane %v1098_v12, 2 }
 0x35a   :  { %v1106_v23 = vmax.f32 %v1104_v10, %v1105_v21  ;;  %v3420_v10 = vld [vmem:[#allocation8 + $0x64] ss:$16 sps:$4 sm:$0xff]  }
 0x35b   :  { %v1100_v24 = vmax.f32 %v1098_v12, %v1099_v22  ;;  %v3418_v12 = vld [vmem:[#allocation8 + $0x60] ss:$16 sps:$4 sm:$0xff]   ;;  %v3426_v21 = vld [vmem:[#allocation8 + $0x84] ss:$16 sps:$4 sm:$0xff]  }
 0x35c   :  { %v1107_v25 = vrot.slane %v1106_v23, 1  ;;  %v3432_v22 = vld [vmem:[#allocation8 + $0xa4] ss:$16 sps:$4 sm:$0xff]  }
 0x35d   :  { %v1101_v26 = vrot.slane %v1100_v24, 1 }
 0x35e   :  { %v1108_v29 = vmax.f32 %v1106_v23, %v1107_v25  ;;  %v3430_v23 = vld [vmem:[#allocation8 + $0xa0] ss:$16 sps:$4 sm:$0xff]  }
 0x35f   :  { %v1102_v30 = vmax.f32 %v1100_v24, %v1101_v26  ;;  %v3438_v24 = vld [vmem:[#allocation8 + $0xc4] ss:$16 sps:$4 sm:$0xff]   ;;  %v3436_v25 = vld [vmem:[#allocation8 + $0xc0] ss:$16 sps:$4 sm:$0xff]  }
 0x360   :  { %v1110_v31 = vmax.f32 %v1096_v19, %v1108_v29 }
 0x361   :  { %v1109_v32 = vmax.f32 %v1095_v20, %v1102_v30 }
 0x362   :  { %v1113_v34 = vsub.f32 %v4188_v7, %v1110_v31  ;;  %v1114_v38 = vsub.f32 %v4186_v4, %v1110_v31  ;;  %v1241_v35 = vsub.f32 %v4192_v50, %v1110_v31  ;;  %v1348_v39 = vsub.f32 %v2957_v3, %v1110_v31  ;;  %v3408_v3 = vld [vmem:[#allocation8 + $0x24] ss:$16 sps:$4 sm:$0xff]  }
 0x363   :  { %v1111_v59 = vsub.f32 %v4182_v56, %v1109_v32  ;;  %v1112_v40 = vsub.f32 %v4180_v51, %v1109_v32  ;;  %v1240_v42 = vsub.f32 %v4195_v54, %v1109_v32  ;;  %v1347_v44 = vsub.f32 %v1060_v8, %v1109_v32  ;;  %v3414_v8 = vld [vmem:[#allocation8 + $0x44] ss:$16 sps:$4 sm:$0xff]  }
 0x364   :  { %v1119_v15 = vmul.f32 1.442695, %v1113_v34  ;;  %v1244_v17 = vmul.f32 1.442695, %v1241_v35  ;;  %v1121_v7 = vmul.f32 1.442695, %v1114_v38 }
 0x365   :  { %v1115_v16 = vmul.f32 1.442695, %v1111_v59  ;;  %v1117_v19 = vmul.f32 1.442695, %v1112_v40  ;;  %v1242_v45 = vmul.f32 1.442695, %v1240_v42 }
 0x366   :  { %3544 = vpow2.f32 %v1119_v15  ;;  %v1349_v4 = vmul.f32 1.442695, %v1347_v44 }
 0x367   :  { %3546 = vpow2.f32 %v1115_v16 }
 0x368   :  { %3548 = vpow2.f32 %v1117_v19 }
 0x369   :  { %3550 = vpow2.f32 %v1242_v45 }
 0x36a   :  { %3552 = vpow2.f32 %v1244_v17 }
 0x36b   :  { %3554 = vpow2.f32 %v1121_v7 }
 0x36c   :  { %3556 = vpow2.f32 %v1349_v4 }
 0x370   :  { %v3545_v56 = vpop.eup %3544 }
 0x371   :  { %v3547_v50 = vpop.eup %3546 }
 0x372   :  { %v3549_v51 = vpop.eup %3548  ;;  %2990 = vmatprep.mubr.f32.mxu1 %v3547_v50 }
 0x373   :  { %v3551_v54 = vpop.eup %3550  ;;  %2991 = vmatmul.mubr.f32.vlgmr.msra.gmra.mrb[12].mxu1 %v3549_v51 }
 0x374   :  { %v3553_v18 = vpop.eup %3552  ;;  %3028 = vmatprep.mubr.f32.mxu0 %v3551_v54  ;;  %3249 = vmatpush3.bf16.msra.mxu1 %v4175_v46  ;;  %v1351_v46 = vmul.f32 1.442695, %v1348_v39 }
 0x375   :  { %3029 = vmatmul.mubr.f32.vlgmr.msra.gmra.mrb[16].mxu0 %v3553_v18  ;;  %2993 = vmatprep.mubr.f32.mxu1 %v3545_v56  ;;  %v3555_v20 = vpop.eup %3554 }
 0x376   :  { %3251 = vmatprep.subr.bf16.mxu1 %v4224_v37  ;;  %3082 = vmatprep.mubr.msk.bf16.mxu0 %vm3720_vm0, %v3719_v0  ;;  %v3557_v49 = vpop.eup %3556  ;;  %3558 = vpow2.f32 %v1351_v46 }
 0x377   :  { %2994 = vmatmul.mubr.f32.gmra.mrb[14].mxu1 %v3555_v20 }
 0x378   :  { %3253 = vmatpush3.bf16.msra.mxu1 %v4224_v37  ;;  %3063 = vmatprep.mubr.f32.mxu1 %v3557_v49 }
 0x379   :  { %3255 = vmatprep.subr.bf16.mxu1 %v4230_v41 }
 0x37c   :  { %3257 = vmatpush3.bf16.msra.mxu1 %v4230_v41  ;;  %v3392_v41 = vld [vmem:[#allocation2 + $0x40] sm:$0xff]  }
 0x37d   :  { %3259 = vmatprep.subr.bf16.mxu1 %v4236_v43  ;;  %3067 = vmatpush3.bf16.msra.mxu0 %v3392_v41 }
 0x37e   :  { %3068 = vmatprep.subr.bf16.mxu0 %v3719_v0 }
 0x380   :  { %3261 = vmatpush3.bf16.msra.mxu1 %v4236_v43  ;;  %v3559_v37 = vpop.eup %3558  ;;  %v3393_v43 = vld [vmem:[#allocation2 + $0x48] sm:$0xff]  }
 0x381   :  { %3263 = vmatprep.subr.bf16.mxu1 %v4242_v48  ;;  %3069 = vmatpush3.bf16.msra.mxu0 %v3393_v43 }
 0x382   :  { %3070 = vmatprep.subr.bf16.mxu0 %v3719_v0 }
 0x384   :  { %3265 = vmatpush3.bf16.msra.mxu1 %v4242_v48  ;;  %v3394_v48 = vld [vmem:[#allocation2 + $0x50] sm:$0xff]  }
 0x385   :  { %3267 = vmatprep.subr.bf16.mxu1 %v4248_v55  ;;  %3071 = vmatpush3.bf16.msra.mxu0 %v3394_v48 }
 0x386   :  { %3072 = vmatprep.subr.bf16.mxu0 %v3719_v0 }
 0x388   :  { %3269 = vmatpush3.bf16.msra.mxu1 %v4248_v55  ;;  %v3396_v55 = vld [vmem:[#allocation2 + $0x60] sm:$0xff]  }
 0x389   :  { %3271 = vmatprep.subr.bf16.mxu1 %v4254_v61  ;;  %3073 = vmatpush3.bf16.msra.mxu0 %v3395_v52 }
 0x38a   :  { %3074 = vmatprep.subr.bf16.mxu0 %v3719_v0 }
 0x38c   :  { %3273 = vmatpush3.bf16.msra.mxu1 %v4254_v61  ;;  %v3400_v61 = vld [vmem:[#allocation8] ss:$16 sps:$4 sm:$0xff]  }
 0x38d   :  { %3275 = vmatprep.subr.bf16.mxu1 %v4256_v2  ;;  %3075 = vmatpush3.bf16.msra.mxu0 %v3396_v55 }
 0x38e   :  { %3076 = vmatprep.subr.bf16.mxu0 %v3719_v0 }
 0x390   :  { %3277 = vmatpush3.bf16.msra.mxu1 %v4256_v2  ;;  %v3405_v2 = vld [vmem:[#allocation8 + $0xc] ss:$16 sps:$4 sm:$0xff]  }
 0x391   :  { %3077 = vmatpush3.bf16.msra.mxu0 %v3397_v57  ;;  %1802 = vmatprep.subr.bf16.mxu1 %v3402_v62 }
 0x392   :  { %3078 = vmatprep.subr.bf16.mxu0 %v3719_v0 }
 0x393   :  { %3064 = vmatmul.mubr.f32.vlgmr.msra.gmra.mrb[16].mxu1 %v3559_v37 }
 0x394   :  { %1834 = vmatprep.mubr.bf16.mxu1 %v3721_v1  ;;  %1803 = vmatpush1.bf16.msra.mxu1 %v3400_v61 }
 0x395   :  { %3079 = vmatpush3.bf16.msra.mxu0 %v3398_v58  ;;  %1804 = vmatprep.subr.bf16.mxu1 %v3408_v3 }
 0x396   :  { %3080 = vmatprep.subr.bf16.mxu0 %v3719_v0  ;;  %v3424_v0 = vld [vmem:[#allocation8 + $0x80] ss:$16 sps:$4 sm:$0xff]  }
 0x398   :  { %1805 = vmatpush1.bf16.msra.mxu1 %v3406_v5 }
 0x399   :  { %3081 = vmatpush3.bf16.msra.mxu0 %v3399_v60  ;;  %1806 = vmatprep.subr.bf16.mxu1 %v3414_v8 }
 0x39a   :  { %1843 = vmatprep.subr.bf16.mxu0 %v3405_v2 }
 0x39c   :  { %1807 = vmatpush1.bf16.msra.mxu1 %v3412_v9 }
 0x39d   :  { %1808 = vmatprep.subr.bf16.mxu1 %v3420_v10 }
 0x3a0   :  { %1809 = vmatpush1.bf16.msra.mxu1 %v3418_v12 }
 0x3a1   :  { %1810 = vmatprep.subr.bf16.mxu1 %v3426_v21 }
 0x3a4   :  { %1811 = vmatpush1.bf16.msra.mxu1 %v3424_v0 }
 0x3a5   :  { %1812 = vmatprep.subr.bf16.mxu1 %v3432_v22 }
 0x3a8   :  { %1813 = vmatpush1.bf16.msra.mxu1 %v3430_v23 }
 0x3a9   :  { %1814 = vmatprep.subr.bf16.mxu1 %v3438_v24 }
 0x3ac   :  { %1815 = vmatpush1.bf16.msra.mxu1 %v3436_v25 }
 0x446   :  { %v2992_v26 = vpop.f32.mrb[12].mxu1 }
 0x447   :  { %v1209_v29 = vmul.f32 %v2992_v26, %v4051_v36  ;;  %v1189_v30 = vpop.f32.mrb[13].mxu1 }
 0x448   :  { %v3030_v31 = vpop.f32.mrb[16].mxu0  ;;  %v1208_v32 = vmul.f32 %v1189_v30, %v4049_v28  ;;  %v1226_v34 = vadd.f32 %v2992_v26, %v1189_v30 }
 0x449   :  { %v1322_v38 = vmul.f32 %v3030_v31, %v4088_v6  ;;  %v1341_v35 = vrot.slane %v3030_v31, 4  ;;  %v1312_v39 = vpop.f32.mrb[17].mxu0 }
 0x44a   :  { %v1212_v59 = vadd.f32 %v1209_v29, %v1208_v32  ;;  %v1227_v40 = vrot.slane %v1226_v34, 4  ;;  %v1321_v42 = vmul.f32 %v1312_v39, %v4084_v63  ;;  %v1335_v44 = vrot.slane %v1312_v39, 4  ;;  %v2995_v15 = vpop.f32.mrb[14].mxu1 }
 0x44b   :  { %v1329_v16 = vrot.slane %v1322_v38, 4  ;;  %v1342_v19 = vadd.f32 %v3030_v31, %v1341_v35  ;;  %v1211_v45 = vmul.f32 %v2995_v15, %v4066_v53  ;;  %v1199_v36 = vpop.f32.mrb[15].mxu1 }
 0x44c   :  { %v1213_v17 = vrot.slane %v1212_v59, 4  ;;  %v1228_v7 = vadd.f32 %v1227_v40, %v1226_v34  ;;  %v1323_v4 = vrot.slane %v1321_v42, 4  ;;  %v1336_v28 = vadd.f32 %v1335_v44, %v1312_v39 }
 0x44d   :  { %v1330_v56 = vadd.f32 %v1329_v16, %v1322_v38  ;;  %v1343_v50 = vrot.slane %v1342_v19, 2  ;;  %v1210_v6 = vmul.f32 %v1199_v36, %v4061_v47  ;;  %v1233_v51 = vadd.f32 %v2995_v15, %v1199_v36 }
 0x44e   :  { %v1214_v54 = vadd.f32 %v1213_v17, %v1212_v59  ;;  %v1229_v18 = vrot.slane %v1228_v7, 2  ;;  %v1324_v20 = vadd.f32 %v1323_v4, %v1321_v42  ;;  %v1337_v63 = vrot.slane %v1336_v28, 2 }
 0x44f   :  { %v1331_v49 = vrot.slane %v1330_v56, 2  ;;  %v1219_v46 = vadd.f32 %v1211_v45, %v1210_v6  ;;  %v1234_v37 = vrot.slane %v1233_v51, 4  ;;  %v1344_v52 = vadd.f32 %v1343_v50, %v1342_v19 }
 0x450   :  { %v1215_v41 = vrot.slane %v1214_v54, 2  ;;  %v1230_v43 = vadd.f32 %v1229_v18, %v1228_v7  ;;  %v1325_v53 = vrot.slane %v1324_v20, 2  ;;  %v1338_v48 = vadd.f32 %v1337_v63, %v1336_v28 }
 0x451   :  { %v1220_v55 = vrot.slane %v1219_v46, 4  ;;  %v1235_v57 = vadd.f32 %v1234_v37, %v1233_v51  ;;  %v1332_v47 = vadd.f32 %v1331_v49, %v1330_v56  ;;  %v1345_v12 = vrot.slane %v1344_v52, 1 }
 0x452   :  { %v1216_v58 = vadd.f32 %v1215_v41, %v1214_v54  ;;  %v1231_v60 = vrot.slane %v1230_v43, 1  ;;  %v1326_v61 = vadd.f32 %v1325_v53, %v1324_v20  ;;  %v1339_v62 = vrot.slane %v1338_v48, 1 }
 0x453   :  { %v1221_v2 = vadd.f32 %v1220_v55, %v1219_v46  ;;  %v1236_v3 = vrot.slane %v1235_v57, 2  ;;  %v1333_v25 = vrot.slane %v1332_v47, 1  ;;  %v1346_v31 = vadd.f32 %v1345_v12, %v1344_v52  ;;  %v3411_v12 = vld [vmem:[#allocation8 + $0x2c] ss:$16 sps:$4 sm:$0xff]  }
 0x454   :  { %v1217_v5 = vrot.slane %v1216_v58, 1  ;;  %v1232_v8 = vadd.f32 %v1231_v60, %v1230_v43  ;;  %v1327_v9 = vrot.slane %v1326_v61, 1  ;;  %v1340_v10 = vadd.f32 %v1339_v62, %v1338_v48 }
 0x455   :  { %v1222_v21 = vrot.slane %v1221_v2, 2  ;;  %v1237_v0 = vadd.f32 %v1236_v3, %v1235_v57  ;;  %v1334_v38 = vadd.f32 %v1333_v25, %v1332_v47  ;;  %v3429_v25 = vld [vmem:[#allocation8 + $0x8c] ss:$16 sps:$4 sm:$0xff]  }
 0x456   :  { %v1218_v22 = vadd.f32 %v1217_v5, %v1216_v58  ;;  %v1328_v23 = vadd.f32 %v1327_v9, %v1326_v61  ;;  %v1458_v24 = vadd.f32 %v1340_v10, %v1232_v8  ;;  %v3403_v9 = vld [vmem:[#allocation8 + $0x8] ss:$16 sps:$4 sm:$0xff]  }
 0x457   :  { %v1223_v26 = vadd.f32 %v1222_v21, %v1221_v2  ;;  %v1238_v29 = vrot.slane %v1237_v0, 1  ;;  %v3409_v21 = vld [vmem:[#allocation8 + $0x28] ss:$16 sps:$4 sm:$0xff]  }
 0x458   :  { %v1454_v30 = vadd.f32 %v1328_v23, %v1218_v22  ;;  %v3415_v22 = vld [vmem:[#allocation8 + $0x48] ss:$16 sps:$4 sm:$0xff]   ;;  %v3423_v23 = vld [vmem:[#allocation8 + $0x6c] ss:$16 sps:$4 sm:$0xff]  }
 0x459   :  { %v1224_v32 = vrot.slane %v1223_v26, 1  ;;  %v1239_v34 = vadd.f32 %v1238_v29, %v1237_v0  ;;  %v3417_v0 = vld [vmem:[#allocation8 + $0x4c] ss:$16 sps:$4 sm:$0xff]  }
 0x45a   :  { %v3435_v29 = vld [vmem:[#allocation8 + $0xac] ss:$16 sps:$4 sm:$0xff]  }
 0x45b   :  { %v1225_v35 = vadd.f32 %v1224_v32, %v1223_v26  ;;  %v1459_v39 = vadd.f32 %v1346_v31, %v1239_v34  ;;  %v3427_v26 = vld [vmem:[#allocation8 + $0x88] ss:$16 sps:$4 sm:$0xff]   ;;  %v3441_v31 = vld [vmem:[#allocation8 + $0xcc] ss:$16 sps:$4 sm:$0xff]   ;;  %v3444_v32 = vld [vmem:[#allocation8 + $0xe4] ss:$16 sps:$4 sm:$0xff]  }
 0x45c   :  { %v3447_v34 = vld [vmem:[#allocation8 + $0xec] ss:$16 sps:$4 sm:$0xff]   ;;  %1816 = vmatprep.subr.bf16.mxu1 %v3444_v32 }
 0x45d   :  { %v1455_v59 = vadd.f32 %v1334_v38, %v1225_v35  ;;  %v3442_v38 = vld [vmem:[#allocation8 + $0xe0] ss:$16 sps:$4 sm:$0xff]   ;;  %v3445_v35 = vld [vmem:[#allocation8 + $0xe8] ss:$16 sps:$4 sm:$0xff]  }
 0x45e   :  { %1817 = vmatpush1.bf16.msra.mxu1 %v3442_v38 }
 0x466   :  { %v3065_v40 = vpop.f32.mrb[16].mxu1 }
 0x467   :  { %v1429_v42 = vmul.f32 %v3065_v40, %v4220_v33  ;;  %v1448_v44 = vrot.slane %v3065_v40, 4  ;;  %v1419_v15 = vpop.f32.mrb[17].mxu1 }
 0x468   :  { %v1428_v16 = vmul.f32 %v1419_v15, %v4217_v27  ;;  %v1442_v19 = vrot.slane %v1419_v15, 4 }
 0x469   :  { %v1436_v45 = vrot.slane %v1429_v42, 4  ;;  %v1449_v36 = vadd.f32 %v3065_v40, %v1448_v44 }
 0x46a   :  { %v1430_v17 = vrot.slane %v1428_v16, 4  ;;  %v1443_v7 = vadd.f32 %v1442_v19, %v1419_v15  ;;  %v1620_v19 = vld [vmem:[%s4405_s12] ss:$4 sm:$0xf] }
 0x46b   :  { %v1437_v4 = vadd.f32 %v1436_v45, %v1429_v42  ;;  %v1450_v28 = vrot.slane %v1449_v36, 2  ;;  %v1632_v45 = vsub.s32 2, %v4032_v11 }
 0x46c   :  { %v1431_v56 = vadd.f32 %v1430_v17, %v1428_v16  ;;  %v1444_v50 = vrot.slane %v1443_v7, 2  ;;  %v1625_v17 = vrot.slane %v1620_v19, %v4038_v14 }
 0x46d   :  { %v1438_v6 = vrot.slane %v1437_v4, 2  ;;  %v1451_v51 = vadd.f32 %v1450_v28, %v1449_v36  ;;  %v1636_v36 = vsub.s32 3, %v4032_v11 }
 0x46e   :  { %v1432_v54 = vrot.slane %v1431_v56, 2  ;;  %v1445_v18 = vadd.f32 %v1444_v50, %v1443_v7  ;;  %v1633_v7 = vrot.slane %v1620_v19, %v1632_v45  ;;  %v3480_v45 = vld [vmem:[#allocation10 + $0xa4] ss:$8 sps:$4 sm:$0xff]  }
 0x46f   :  { %v1439_v20 = vadd.f32 %v1438_v6, %v1437_v4  ;;  %v1452_v63 = vrot.slane %v1451_v51, 1  ;;  %v1629_v4 = vrot.slane %v1620_v19, %v4035_v13  ;;  %v1637_v28 = vrot.slane %v1620_v19, %v1636_v36  ;;  %v3478_v36 = vld [vmem:[#allocation10 + $0xa0] ss:$8 sps:$4 sm:$0xff]  }
 0x470   :  { %v1433_v33 = vadd.f32 %v1432_v54, %v1431_v56  ;;  %v1446_v49 = vrot.slane %v1445_v18, 1 }
 0x471   :  { %v1440_v46 = vrot.slane %v1439_v20, 1  ;;  %v1453_v37 = vadd.f32 %v1452_v63, %v1451_v51 }
 0x472   :  { %v1434_v27 = vrot.slane %v1433_v33, 1  ;;  %v1447_v41 = vadd.f32 %v1446_v49, %v1445_v18 }
 0x473   :  { %v1441_v43 = vadd.f32 %v1440_v46, %v1439_v20  ;;  %v1461_v53 = vadd.f32 %v1459_v39, %v1453_v37  ;;  %v2590_v39 = vld [vmem:[%s4401_s8 + $0x1] ss:$0 sm:$0xff] }
 0x474   :  { %v1435_v48 = vadd.f32 %v1434_v27, %v1433_v33  ;;  %v1460_v52 = vadd.f32 %v1458_v24, %v1447_v41  ;;  %v3421_v24 = vld [vmem:[#allocation8 + $0x68] ss:$16 sps:$4 sm:$0xff]  }
 0x475   :  { %v1457_v55 = vadd.f32 %v1455_v59, %v1441_v43  ;;  %3560 = vrcp.f32 %v1461_v53 }
 0x476   :  { %v1456_v57 = vadd.f32 %v1454_v30, %v1435_v48  ;;  %3562 = vrcp.f32 %v1460_v52  ;;  %v3433_v30 = vld [vmem:[#allocation8 + $0xa8] ss:$16 sps:$4 sm:$0xff]  }
 0x477   :  { %v3448_v52 = vld [vmem:[#allocation10] ss:$8 sps:$4 sm:$0xff]  }
 0x47f   :  { %v3561_v58 = vpop.eup %3560 }
 0x480   :  { %v3563_v60 = vpop.eup %3562  ;;  %v1465_v61 = vmul.f32 %v3561_v58, %v1457_v55  ;;  %v3450_v55 = vld [vmem:[#allocation10 + $0x4] ss:$8 sps:$4 sm:$0xff]   ;;  %v3451_v58 = vld [vmem:[#allocation10 + $0x10] ss:$8 sps:$4 sm:$0xff]  }
 0x481   :  { %v1464_v62 = vmul.f32 %v3563_v60, %v1456_v57  ;;  %v3453_v57 = vld [vmem:[#allocation10 + $0x14] ss:$8 sps:$4 sm:$0xff]   ;;  %2390 = vmatprep.subr.bf16.mxu1 %v3450_v55  ;;  %v3456_v60 = vld [vmem:[#allocation10 + $0x24] ss:$8 sps:$4 sm:$0xff]  }
 0x482   :  { %v1467_v47 = vpack.c.bf16 %v1465_v61, %v1465_v61  ;;  %v3454_v61 = vld [vmem:[#allocation10 + $0x20] ss:$8 sps:$4 sm:$0xff]  }
 0x483   :  { %v1466_v2 = vpack.c.bf16 %v1464_v62, %v1464_v62  ;;  %v3459_v62 = vld [vmem:[#allocation10 + $0x34] ss:$8 sps:$4 sm:$0xff]  }
 0x484   :  { %v1493_v3 = vunpack.c.l.b16 %v1467_v47  ;;  %v3457_v47 = vld [vmem:[#allocation10 + $0x30] ss:$8 sps:$4 sm:$0xff]  }
 0x485   :  { %v1492_v5 = vunpack.c.l.b16 %v1466_v2  ;;  %v3462_v2 = vld [vmem:[#allocation10 + $0x44] ss:$8 sps:$4 sm:$0xff]  }
 0x487   :  { %v1495_v8 = vsel %vm1494_vm2, %v1493_v3, %v1492_v5  ;;  %v3460_v3 = vld [vmem:[#allocation10 + $0x40] ss:$8 sps:$4 sm:$0xff]   ;;  %v3465_v5 = vld [vmem:[#allocation10 + $0x54] ss:$8 sps:$4 sm:$0xff]  }
 0x488   :  { %v1496_v10 = vpack.c.b16 %v1495_v8, %v1495_v8  ;;  %v3463_v8 = vld [vmem:[#allocation10 + $0x50] ss:$8 sps:$4 sm:$0xff]  }
 0x48a   :  { %3083 = vmatmul.mubr.bf16.vlgmr.msra.gmra.mrb[20].mxu0 %v1496_v10  ;;  %v3466_v10 = vld [vmem:[#allocation10 + $0x60] ss:$8 sps:$4 sm:$0xff]  }
 0x48b   :  { %1844 = vmatpush1.bf16.msra.mxu0 %v3403_v9  ;;  %1875 = vmatprep.mubr.bf16.mxu0 %v3721_v1  ;;  %v3439_v1 = vld [vmem:[#allocation8 + $0xc8] ss:$16 sps:$4 sm:$0xff]   ;;  %v3468_v9 = vld [vmem:[#allocation10 + $0x64] ss:$8 sps:$4 sm:$0xff]  }
 0x48c   :  { %1845 = vmatprep.subr.bf16.mxu0 %v3411_v12  ;;  %v3471_v12 = vld [vmem:[#allocation10 + $0x74] ss:$8 sps:$4 sm:$0xff]  }
 0x48f   :  { %1846 = vmatpush1.bf16.msra.mxu0 %v3409_v21  ;;  %v3469_v21 = vld [vmem:[#allocation10 + $0x70] ss:$8 sps:$4 sm:$0xff]  }
 0x490   :  { %1847 = vmatprep.subr.bf16.mxu0 %v3417_v0  ;;  %v3474_v0 = vld [vmem:[#allocation10 + $0x84] ss:$8 sps:$4 sm:$0xff]  }
 0x493   :  { %1848 = vmatpush1.bf16.msra.mxu0 %v3415_v22  ;;  %v3472_v22 = vld [vmem:[#allocation10 + $0x80] ss:$8 sps:$4 sm:$0xff]  }
 0x494   :  { %1849 = vmatprep.subr.bf16.mxu0 %v3423_v23  ;;  %v3477_v23 = vld [vmem:[#allocation10 + $0x94] ss:$8 sps:$4 sm:$0xff]  }
 0x497   :  { %1850 = vmatpush1.bf16.msra.mxu0 %v3421_v24  ;;  %v3475_v24 = vld [vmem:[#allocation10 + $0x90] ss:$8 sps:$4 sm:$0xff]  }
 0x498   :  { %1851 = vmatprep.subr.bf16.mxu0 %v3429_v25 }
 0x49b   :  { %1852 = vmatpush1.bf16.msra.mxu0 %v3427_v26 }
 0x49c   :  { %1853 = vmatprep.subr.bf16.mxu0 %v3435_v29 }
 0x49f   :  { %1854 = vmatpush1.bf16.msra.mxu0 %v3433_v30 }
 0x4a0   :  { %1855 = vmatprep.subr.bf16.mxu0 %v3441_v31 }
 0x4a3   :  { %1856 = vmatpush1.bf16.msra.mxu0 %v3439_v1 }
 0x4a4   :  { %1857 = vmatprep.subr.bf16.mxu0 %v3447_v34 }
 0x4a7   :  { %1858 = vmatpush1.bf16.msra.mxu0 %v3445_v35 }
 0x55d   :  { %v1580_v59 = vpop.f32.mrb[20].mxu0 }
 0x55e   :  { %v1581_v40 = vadd.f32 %v2590_v39, %v1580_v59  ;;  %v3084_v42 = vpop.f32.mrb[21].mxu0 }
 0x55f   :  { %v1583_v44 = vpop.f32.mrb[22].mxu0 }
 0x560   :  { %v1587_v15 = vpack.c.bf16 %v1581_v40, %v1581_v40  ;;  %1586 = vst [vmem:[#allocation11] sm:$0x3] %v1581_v40  ;;  %v3085_v16 = vpop.f32.mrb[23].mxu0 }
 0x562   :  { %1835 = vmatmul.mubr.bf16.vlgmr.msra.gmra.mrb[20].mxu1 %v1587_v15  ;;  %1876 = vmatmul.mubr.bf16.vlgmr.msra.gmra.mrb[24].mxu0 %v1587_v15 }
 0x563   :  { %2391 = vmatpush1.bf16.msra.mxu1 %v3448_v52  ;;  %v4351_v52 = vld [vmem:[%s4405_s12 + $0x9] ss:$4 sm:$0x3] }
 0x564   :  { %2392 = vmatprep.subr.bf16.mxu1 %v3453_v57 }
 0x567   :  { %2393 = vmatpush1.bf16.msra.mxu1 %v3451_v58 }
 0x568   :  { %2394 = vmatprep.subr.bf16.mxu1 %v3456_v60 }
 0x56b   :  { %2395 = vmatpush1.bf16.msra.mxu1 %v3454_v61  ;;  %v4358_v61 = vld [vmem:[%s4405_s12 + $0xa] ss:$4 sm:$0x3] }
 0x56c   :  { %2396 = vmatprep.subr.bf16.mxu1 %v3459_v62 }
 0x56f   :  { %2397 = vmatpush1.bf16.msra.mxu1 %v3457_v47 }
 0x570   :  { %2398 = vmatprep.subr.bf16.mxu1 %v3462_v2  ;;  %v1970_v2 = vrot.slane %v4351_v52, %v4035_v13 }
 0x573   :  { %2399 = vmatpush1.bf16.msra.mxu1 %v3460_v3 }
 0x574   :  { %2400 = vmatprep.subr.bf16.mxu1 %v3465_v5 }
 0x577   :  { %2401 = vmatpush1.bf16.msra.mxu1 %v3463_v8 }
 0x578   :  { %2402 = vmatprep.subr.bf16.mxu1 %v3468_v9 }
 0x57b   :  { %2403 = vmatpush1.bf16.msra.mxu1 %v3466_v10  ;;  %v1983_v10 = vrot.slane %v4358_v61, %v4035_v13 }
 0x57c   :  { %2404 = vmatprep.subr.bf16.mxu1 %v3471_v12 }
 0x57f   :  { %2405 = vmatpush1.bf16.msra.mxu1 %v3469_v21 }
 0x580   :  { %2406 = vmatprep.subr.bf16.mxu1 %v3474_v0 }
 0x583   :  { %2407 = vmatpush1.bf16.msra.mxu1 %v3472_v22 }
 0x584   :  { %2408 = vmatprep.subr.bf16.mxu1 %v3477_v23  ;;  %v3496_v23 = vld [vmem:[#allocation10 + $0x100] ss:$8 sps:$4 sm:$0xff]  }
 0x587   :  { %2409 = vmatpush1.bf16.msra.mxu1 %v3475_v24 }
 0x588   :  { %2410 = vmatprep.subr.bf16.mxu1 %v3480_v45  ;;  %v3522_v45 = vld [vmem:[#allocation10 + $0x184] ss:$8 sps:$4 sm:$0xff]  }
 0x58b   :  { %2411 = vmatpush1.bf16.msra.mxu1 %v3478_v36  ;;  %v3520_v36 = vld [vmem:[#allocation10 + $0x180] ss:$8 sps:$4 sm:$0xff]  }
 0x635   :  { %v1836_v56 = vpop.f32.mrb[20].mxu1  ;;  %v1877_v50 = vpop.f32.mrb[24].mxu0 }
 0x636   :  { %v1837_v6 = vadd.f32 %v1836_v56, %v1625_v17  ;;  %v1838_v51 = vpop.f32.mrb[21].mxu1  ;;  %v1879_v54 = vpop.f32.mrb[25].mxu0  ;;  %v4324_v18 = vadd.f32 %v1877_v50, %v1633_v7  ;;  %v3483_v17 = vld [vmem:[#allocation10 + $0xb4] ss:$8 sps:$4 sm:$0xff]   ;;  %v3481_v7 = vld [vmem:[#allocation10 + $0xb0] ss:$8 sps:$4 sm:$0xff]  }
 0x637   :  { %v1839_v20 = vadd.f32 %v1838_v51, %v1629_v4  ;;  %v1880_v63 = vadd.f32 %v1879_v54, %v1637_v28  ;;  %v1840_v33 = vpop.f32.mrb[22].mxu1  ;;  %v1881_v49 = vpop.f32.mrb[26].mxu0  ;;  %2412 = vmatprep.subr.bf16.mxu1 %v3483_v17  ;;  %v3486_v4 = vld [vmem:[#allocation10 + $0xc4] ss:$8 sps:$4 sm:$0xff]   ;;  %v3484_v28 = vld [vmem:[#allocation10 + $0xc0] ss:$8 sps:$4 sm:$0xff]  }
 0x638   :  { %v1841_v46 = vpop.f32.mrb[23].mxu1  ;;  %v1882_v11 = vpop.f32.mrb[27].mxu0  ;;  %v1889_v37 = vsel %vm1888_vm3, %v1837_v6, 0.0  ;;  %v1942_v43 = vsel %vm1888_vm3, %v4324_v18, 0.0  ;;  %2413 = vmatpush1.bf16.msra.mxu1 %v3481_v7  ;;  %v3489_v56 = vld [vmem:[#allocation10 + $0xd4] ss:$8 sps:$4 sm:$0xff]  }
 0x639   :  { %v1890_v27 = vsel %vm1888_vm3, %v1839_v20, 0.0  ;;  %v1943_v53 = vsel %vm1888_vm3, %v1880_v63, 0.0  ;;  %2414 = vmatprep.subr.bf16.mxu1 %v3486_v4  ;;  %v3487_v50 = vld [vmem:[#allocation10 + $0xd0] ss:$8 sps:$4 sm:$0xff]   ;;  %v3490_v51 = vld [vmem:[#allocation10 + $0xe0] ss:$8 sps:$4 sm:$0xff]  }
 0x63a   :  { %v1891_v41 = vadd.f32 %v1890_v27, %v1889_v37  ;;  %v1944_v48 = vadd.f32 %v1943_v53, %v1942_v43  ;;  %v3495_v54 = vld [vmem:[#allocation10 + $0xf4] ss:$8 sps:$4 sm:$0xff]   ;;  %v2631_v27 = vld [vmem:[%s4405_s12 + $0x1] ss:$4 sm:$0x3] }
 0x63b   :  { %v1914_v43 = vrot.slane %v2631_v27, %v4038_v14  ;;  %v1918_v53 = vrot.slane %v2631_v27, %v4035_v13  ;;  %v3525_v17 = vld [vmem:[#allocation10 + $0x194] ss:$8 sps:$4 sm:$0xff]   ;;  %v3523_v7 = vld [vmem:[#allocation10 + $0x190] ss:$8 sps:$4 sm:$0xff]   ;;  %v3528_v4 = vld [vmem:[#allocation10 + $0x1a4] ss:$8 sps:$4 sm:$0xff]  }
 0x63c   :  { %1892 = vadd.xlane.f32.xlu0 %v1891_v41  ;;  %2415 = vmatpush1.bf16.msra.mxu1 %v3484_v28  ;;  %v2632_v41 = vld [vmem:[%s4405_s12 + $0x2] ss:$4 sm:$0x3]  ;;  %s3723_s12 = smov [#allocation11]  }
 0x63d   :  { %2416 = vmatprep.subr.bf16.mxu1 %v3489_v56  ;;  %v1927_v57 = vrot.slane %v2632_v41, %v4038_v14  ;;  %v1931_v58 = vrot.slane %v2632_v41, %v4035_v13  ;;  %v3526_v28 = vld [vmem:[#allocation10 + $0x1a0] ss:$8 sps:$4 sm:$0xff]   ;;  %v3531_v56 = vld [vmem:[#allocation10 + $0x1b4] ss:$8 sps:$4 sm:$0xff]   ;;  %s2490_s17 = sshll.u32 %s3723_s12, 4  ;;  %s2491_s17 = int_to_ptr.vmem [resolvable:$true] %s2490_s17 }
 0x63e   :  { %s3678_s24 = scalar_lea.vmem %s2491_s17, 32  ;;  %p3683_p13 = scmp.lt.s32.totalorder %s2491_s17, %s2491_s17 }
 0x63f   :  { %p3679_p12 = scmp.ne.s32.totalorder %s2491_s17, %s3678_s24  ;;  %p3684_p0 = scmp.lt.s32.totalorder %s3678_s24, %s3678_s24 }
 0x640   :  { %1945 = vadd.xlane.f32.xlu0 %v1944_v48  ;;  %2417 = vmatpush1.bf16.msra.mxu1 %v3487_v50  ;;  %v3529_v50 = vld [vmem:[#allocation10 + $0x1b0] ss:$8 sps:$4 sm:$0xff]  }
 0x641   :  { %p3685_p1 = por %p3684_p0, %p3683_p13 }
 0x643   :  { %p3686_p2 = pnand %p3685_p1, %p3679_p12 }
 0x6c9   :  { %v1893_v25 = vpop.xlane.xlu0 %1892 }
 0x6ca   :  { %v1895_v26 = vmul.f32 0.00390625, %v1893_v25 }
 0x6cc   :  { %v1896_v29 = vsub.f32 %v1837_v6, %v1895_v26  ;;  %v1897_v30 = vsub.f32 %v1839_v20, %v1895_v26  ;;  %v3492_v6 = vld [vmem:[#allocation10 + $0xe4] ss:$8 sps:$4 sm:$0xff]   ;;  %v3501_v26 = vld [vmem:[#allocation10 + $0x114] ss:$8 sps:$4 sm:$0xff]  }
 0x6cd   :  { %v1946_v31 = vpop.xlane.xlu0 %1945  ;;  %2418 = vmatprep.subr.bf16.mxu1 %v3492_v6  ;;  %v3498_v20 = vld [vmem:[#allocation10 + $0x104] ss:$8 sps:$4 sm:$0xff]  }
 0x6ce   :  { %v1947_v1 = vmul.f32 0.00390625, %v1946_v31  ;;  %v1898_v32 = vmul.f32 %v1896_v29, %v1896_v29  ;;  %v1899_v34 = vmul.f32 %v1897_v30, %v1897_v30  ;;  %2419 = vmatpush1.bf16.msra.mxu1 %v3490_v51  ;;  %v3534_v6 = vld [vmem:[#allocation10 + $0x1c4] ss:$8 sps:$4 sm:$0xff]   ;;  %v3532_v51 = vld [vmem:[#allocation10 + $0x1c0] ss:$8 sps:$4 sm:$0xff]  }
 0x6cf   :  { %2420 = vmatprep.subr.bf16.mxu1 %v3495_v54 }
 0x6d0   :  { %v4332_v38 = vsub.f32 %v4324_v18, %v1947_v1  ;;  %v1949_v35 = vsub.f32 %v1880_v63, %v1947_v1  ;;  %v1900_v39 = vsel %vm1888_vm3, %v1898_v32, 0.0  ;;  %v1901_v59 = vsel %vm1888_vm3, %v1899_v34, 0.0  ;;  %v3493_v18 = vld [vmem:[#allocation10 + $0xf0] ss:$8 sps:$4 sm:$0xff]   ;;  %v3504_v1 = vld [vmem:[#allocation10 + $0x124] ss:$8 sps:$4 sm:$0xff]  }
 0x6d1   :  { %v1902_v40 = vadd.f32 %v1901_v59, %v1900_v39  ;;  %v3502_v32 = vld [vmem:[#allocation10 + $0x120] ss:$8 sps:$4 sm:$0xff]   ;;  %v3507_v34 = vld [vmem:[#allocation10 + $0x134] ss:$8 sps:$4 sm:$0xff]   ;;  %v3510_v39 = vld [vmem:[#allocation10 + $0x144] ss:$8 sps:$4 sm:$0xff]  }
 0x6d2   :  { %v1950_v42 = vmul.f32 %v4332_v38, %v4332_v38  ;;  %v1951_v44 = vmul.f32 %v1949_v35, %v1949_v35  ;;  %2421 = vmatpush1.bf16.msra.mxu1 %v3493_v18  ;;  %v3508_v59 = vld [vmem:[#allocation10 + $0x140] ss:$8 sps:$4 sm:$0xff]   ;;  %v1966_v18 = vrot.slane %v4351_v52, %v4038_v14 }
 0x6d3   :  { %1903 = vadd.xlane.f32.xlu1 %v1902_v40  ;;  %2431 = vmatprep.subr.bf16.mxu1 %v3498_v20  ;;  %v3513_v40 = vld [vmem:[#allocation10 + $0x154] ss:$8 sps:$4 sm:$0xff]  }
 0x6d4   :  { %v1952_v15 = vsel %vm1888_vm3, %v1950_v42, 0.0  ;;  %v1953_v16 = vsel %vm1888_vm3, %v1951_v44, 0.0  ;;  %v3511_v42 = vld [vmem:[#allocation10 + $0x150] ss:$8 sps:$4 sm:$0xff]   ;;  %v3516_v44 = vld [vmem:[#allocation10 + $0x164] ss:$8 sps:$4 sm:$0xff]  }
 0x6d5   :  { %v1954_v19 = vadd.f32 %v1953_v16, %v1952_v15  ;;  %v3514_v15 = vld [vmem:[#allocation10 + $0x160] ss:$8 sps:$4 sm:$0xff]   ;;  %v3519_v16 = vld [vmem:[#allocation10 + $0x174] ss:$8 sps:$4 sm:$0xff]  }
 0x6d6   :  { %v3537_v20 = vld [vmem:[#allocation10 + $0x1d4] ss:$8 sps:$4 sm:$0xff]  }
 0x6d7   :  { %1955 = vadd.xlane.f32.xlu1 %v1954_v19  ;;  %v3517_v19 = vld [vmem:[#allocation10 + $0x170] ss:$8 sps:$4 sm:$0xff]  }
 0x760   :  { %v1904_v63 = vpop.xlane.xlu1 %1903 }
 0x761   :  { %v1905_v33 = vmul.f32 0.00390625, %v1904_v63  ;;  %v3535_v63 = vld [vmem:[#allocation10 + $0x1d0] ss:$8 sps:$4 sm:$0xff]  }
 0x763   :  { %v1906_v49 = vadd.f32 1e-05, %v1905_v33  ;;  %v1979_v33 = vrot.slane %v4358_v61, %v4038_v14 }
 0x764   :  { %v1956_v46 = vpop.xlane.xlu1 %1955 }
 0x765   :  { %3564 = vrsqrt.f32 %v1906_v49  ;;  %v1957_v11 = vmul.f32 0.00390625, %v1956_v46  ;;  %v3540_v49 = vld [vmem:[#allocation10 + $0x1e4] ss:$8 sps:$4 sm:$0xff]  }
 0x767   :  { %v1958_v37 = vadd.f32 1e-05, %v1957_v11  ;;  %v3538_v11 = vld [vmem:[#allocation10 + $0x1e0] ss:$8 sps:$4 sm:$0xff]  }
 0x769   :  { %3566 = vrsqrt.f32 %v1958_v37  ;;  %v3543_v37 = vld [vmem:[#allocation10 + $0x1f4] ss:$8 sps:$4 sm:$0xff]  }
 0x76f   :  { %v3565_v48 = vpop.eup %3564 }
 0x770   :  { %v1909_v55 = vmul.f32 %v3565_v48, %v1897_v30  ;;  %v1908_v60 = vmul.f32 %v3565_v48, %v1896_v29  ;;  %v3499_v30 = vld [vmem:[#allocation10 + $0x110] ss:$8 sps:$4 sm:$0xff]  }
 0x772   :  { %v1922_v62 = vmul.f32 %v1918_v53, %v1909_v55  ;;  %v1921_v47 = vmul.f32 %v1914_v43, %v1908_v60 }
 0x773   :  { %v4362_v3 = vpop.eup %3566 }
 0x774   :  { %v1935_v5 = vadd.f32 %v1931_v58, %v1922_v62  ;;  %v1934_v8 = vadd.f32 %v1927_v57, %v1921_v47  ;;  %v1961_v9 = vmul.f32 %v4362_v3, %v1949_v35  ;;  %v3505_v35 = vld [vmem:[#allocation10 + $0x130] ss:$8 sps:$4 sm:$0xff]   ;;  %v1960_v54 = vmul.f32 %v4362_v3, %v4332_v38 }
 0x775   :  { %v3541_v38 = vld [vmem:[#allocation10 + $0x1f0] ss:$8 sps:$4 sm:$0xff]  }
 0x776   :  { %v1937_v12 = vmax.f32 %v1935_v5, 0.0  ;;  %v1936_v21 = vmax.f32 %v1934_v8, 0.0  ;;  %v1974_v0 = vmul.f32 %v1970_v2, %v1961_v9  ;;  %v1973_v46 = vmul.f32 %v1966_v18, %v1960_v54 }
 0x778   :  { %v1991_v22 = vpack.c.bf16 %v1937_v12, %v1937_v12  ;;  %v1990_v24 = vpack.c.bf16 %v1936_v21, %v1936_v21  ;;  %v1987_v25 = vadd.f32 %v1983_v10, %v1974_v0  ;;  %v1986_v27 = vadd.f32 %v1979_v33, %v1973_v46 }
 0x77a   :  { %2422 = vmatprep.mubr.bf16.mxu1 %v1991_v22  ;;  %v1989_v29 = vmax.f32 %v1987_v25, 0.0  ;;  %v1988_v41 = vmax.f32 %v1986_v27, 0.0 }
 0x77b   :  { %2423 = vmatmul.mubr.bf16.vlgmr.msra.gmra.mrb[24].mxu1 %v1990_v24 }
 0x77c   :  { %2432 = vmatpush1.bf16.msra.mxu1 %v3496_v23  ;;  %v1993_v31 = vpack.c.bf16 %v1989_v29, %v1989_v29  ;;  %v1992_v43 = vpack.c.bf16 %v1988_v41, %v1988_v41 }
 0x77d   :  { %2433 = vmatprep.subr.bf16.mxu1 %v3501_v26 }
 0x77e   :  { %2463 = vmatprep.mubr.bf16.mxu1 %v1993_v31 }
 0x780   :  { %2434 = vmatpush1.bf16.msra.mxu1 %v3499_v30 }
 0x781   :  { %2435 = vmatprep.subr.bf16.mxu1 %v3504_v1 }
 0x784   :  { %2436 = vmatpush1.bf16.msra.mxu1 %v3502_v32 }
 0x785   :  { %2437 = vmatprep.subr.bf16.mxu1 %v3507_v34 }
 0x788   :  { %2438 = vmatpush1.bf16.msra.mxu1 %v3505_v35 }
 0x789   :  { %2439 = vmatprep.subr.bf16.mxu1 %v3510_v39 }
 0x78c   :  { %2440 = vmatpush1.bf16.msra.mxu1 %v3508_v59 }
 0x78d   :  { %2441 = vmatprep.subr.bf16.mxu1 %v3513_v40 }
 0x790   :  { %2442 = vmatpush1.bf16.msra.mxu1 %v3511_v42 }
 0x791   :  { %2443 = vmatprep.subr.bf16.mxu1 %v3516_v44 }
 0x794   :  { %2444 = vmatpush1.bf16.msra.mxu1 %v3514_v15 }
 0x795   :  { %2445 = vmatprep.subr.bf16.mxu1 %v3519_v16 }
 0x798   :  { %2446 = vmatpush1.bf16.msra.mxu1 %v3517_v19 }
 0x799   :  { %2447 = vmatprep.subr.bf16.mxu1 %v3522_v45 }
 0x79c   :  { %2448 = vmatpush1.bf16.msra.mxu1 %v3520_v36 }
 0x79d   :  { %2449 = vmatprep.subr.bf16.mxu1 %v3525_v17 }
 0x7a0   :  { %2450 = vmatpush1.bf16.msra.mxu1 %v3523_v7 }
 0x7a1   :  { %2451 = vmatprep.subr.bf16.mxu1 %v3528_v4 }
 0x7a4   :  { %2452 = vmatpush1.bf16.msra.mxu1 %v3526_v28 }
 0x7a5   :  { %2453 = vmatprep.subr.bf16.mxu1 %v3531_v56 }
 0x7a8   :  { %2454 = vmatpush1.bf16.msra.mxu1 %v3529_v50 }
 0x7a9   :  { %2455 = vmatprep.subr.bf16.mxu1 %v3534_v6 }
 0x7ac   :  { %2456 = vmatpush1.bf16.msra.mxu1 %v3532_v51 }
 0x7ad   :  { %2457 = vmatprep.subr.bf16.mxu1 %v3537_v20 }
 0x7b0   :  { %2458 = vmatpush1.bf16.msra.mxu1 %v3535_v63 }
 0x7b1   :  { %2459 = vmatprep.subr.bf16.mxu1 %v3540_v49 }
 0x7b4   :  { %2460 = vmatpush1.bf16.msra.mxu1 %v3538_v11 }
 0x7b5   :  { %2461 = vmatprep.subr.bf16.mxu1 %v3543_v37 }
 0x7b8   :  { %2462 = vmatpush1.bf16.msra.mxu1 %v3541_v38 }
 0x7bb   :  { %2464 = vmatmul.mubr.bf16.vlgmr.msra.gmra.mrb[24].mxu1 %v1992_v43 }
 0x7bc   :  { %3689 = shalt.err (!%p3686_p2)
}
 0x7bd   :  { %s3690_s23 = scalar_lea.hbm %s4408_s15, 32 }
 0x7be   :  { %p3691_p3 = scmp.ne.s32.totalorder %s4408_s15, %s3690_s23  ;;  %p3694_p4 = scmp.lt.u32.totalorder %s3690_s23, %s4408_s15 }
 0x7c0   :  { %p3696_p5 = pnand %p3694_p4, %p3691_p3 }
 0x7c2   :  { %3699 = shalt.err (!%p3696_p5)
}
 0x7c3   :  { %2493 = dma.vmem_to_hbm [thread:$0]  %s2491_s17, 32, %s4408_s15, [#allocation4]   ;;  %v2058_v53 = vld [vmem:[%s4407_s14] sm:$0x3] }
 0x7c4   :  { %v2063_v48 = vrot.slane %v2058_v53, %v4038_v14  ;;  %v2067_v52 = vrot.slane %v2058_v53, %v4035_v13 }
 0x88e   :  { %v2465_v55 = vpop.f32.mrb[24].mxu1 }
 0x88f   :  { %v3278_v57 = vadd.f32 %v2465_v55, %v2063_v48  ;;  %v2467_v58 = vpop.f32.mrb[25].mxu1 }
 0x890   :  { %v3279_v60 = vadd.f32 %v2467_v58, %v2067_v52  ;;  %v2469_v61 = vpop.f32.mrb[26].mxu1 }
 0x891   :  { %v2470_v62 = vpop.f32.mrb[27].mxu1 }
 0x892   :  { %v2474_v47 = vcombine.low %v3278_v57, %v3279_v60 }
 0x894   :  { %2699 = vst.sshfl [vmem:[%s4409_s16] sm:$0x33 pattern:$0x76325410] %v2474_v47 }
 0x895   :  { %3706 = dma.done.wait [#allocation4], 32  }
 0x896   :  { %3707 = vsyncadd [#allocation4], 4294967264 }
 0x897   :  { %2501 = vsyncpa [#allocation3], 1 }
 0x898   :  { %2502 = vsyncpa [#allocation6], 1 }
 0x899   :  { %2503 = vsyncpa [#allocation9], 1 }
 0x89a   :  { %2504 = vsyncpa [#allocation4], 1 }

</bundles_post_ra>
